<compile_context>
chip_gen: v5e
topology: v5e:2x2
jax: 0.10.0
libtpu: 0.0.40
codegen_flags: <defaults>
</compile_context>

<pallas_src>
import jax
import jax.numpy as jnp
import numpy as np
from jax.experimental import pallas as pl
from jax.experimental.pallas import tpu as pltpu


# ----------------------------- Pallas kernels ------------------------------

def _conv_bn_silu_compute(x_ref, w_ref, scale_ref, bias_ref, res_ref, o_ref):
    # x_ref:    (TH + kh - 1, W + kw - 1, Cin)  bf16, zero-padded halo tile
    # w_ref:    (kh, kw*Cin, Cout)              bf16
    # scale/bias: (1, Cout)                     f32 (folded BatchNorm)
    # res_ref:  (TH, W, Cout) f32 or None       (fused residual add)
    # o_ref:    (TH, W, Cout) f32
    THp, Wp, Cin = x_ref.shape
    kh, KC, Cout = w_ref.shape
    kw = KC // Cin
    TH = THp - (kh - 1)
    W = Wp - (kw - 1)

    xb = x_ref[...]                      # bf16
    w = w_ref[...]                       # bf16

    acc = jnp.zeros((TH * W, Cout), jnp.float32)
    for ky in range(kh):
        xk = xb[ky:ky + TH]                                   # (TH, Wp, Cin)
        # Fold kx into the contraction: lane-contiguous (TH*W, kw*Cin) patch,
        # one MXU matmul per ky with a (kw*Cin, Cout) weight slab.
        patch = jnp.concatenate(
            [xk[:, kx:kx + W, :] for kx in range(kw)], axis=-1)  # (TH, W, kw*Cin)
        acc += jnp.dot(patch.reshape(TH * W, kw * Cin), w[ky],
                       preferred_element_type=jnp.float32)

    y = acc.reshape(TH, W, Cout)
    y = y * scale_ref[...].reshape(1, 1, Cout) + bias_ref[...].reshape(1, 1, Cout)
    y = y * jax.nn.sigmoid(y)            # SiLU (sigmoid -> EUP slot)
    if res_ref is not None:
        y = y + res_ref[...]             # fused shortcut add (f32)
    o_ref[...] = y.astype(o_ref.dtype)


def _conv_bn_silu_kernel(x_ref, w_ref, scale_ref, bias_ref, o_ref):
    _conv_bn_silu_compute(x_ref, w_ref, scale_ref, bias_ref, None, o_ref)


def _conv_bn_silu_res_kernel(x_ref, w_ref, scale_ref, bias_ref, res_ref, o_ref):
    _conv_bn_silu_compute(x_ref, w_ref, scale_ref, bias_ref, res_ref, o_ref)


# ----------------------------- kernel wrapper -------------------------------

def _pick_tile_rows(H, Wp, Cin, Cout, kh, max_tile_rows):
    """Largest multiple-of-8 divisor of H that keeps per-block VMEM modest."""
    if H % 8 != 0:
        return H
    cands = [t for t in range(8, H + 1, 8) if H % t == 0 and t <= max_tile_rows]
    if not cands:
        return H
    budget = 8 * 1024 * 1024   # per-block budget so 2x-buffered tiles fit v7x VMEM
    ok = [t for t in cands
          if (t + kh - 1) * Wp * Cin * 2 + 2 * t * Wp * Cout * 4 <= budget]
    return max(ok) if ok else min(cands)


def _compiler_params(block_bytes):
    # Explicit scoped-VMEM limit (v5e default is only 16 MiB); capped so it is
    # safe on v7x's 64 MiB physical VMEM.
    limit = int(min(max(32 << 20, 4 * block_bytes + (8 << 20)), 48 << 20))
    return pltpu.CompilerParams(
        dimension_semantics=("parallel", "parallel"),
        vmem_limit_bytes=limit)


def conv_bn_silu(x, w, scale, bias, residual=None, *, max_tile_rows=256):
    """Fused same-pad stride-1 conv (no conv bias) + BN scale/bias + SiLU
    (+ optional residual).

    x: (B, H, W, Cin) f32 NHWC.  w: (kh, kw, Cin, Cout) HWIO.
    scale/bias: (Cout,) folded BatchNorm.  residual: (B, H, W, Cout) f32 | None.
    """
    B, H, W, Cin = x.shape
    kh, kw, wcin, Cout = w.shape
    assert wcin == Cin and kh % 2 == 1 and kw % 2 == 1
    ph, pw = kh // 2, kw // 2
    Wp = W + 2 * pw

    TH = _pick_tile_rows(H, Wp, Cin, Cout, kh, max_tile_rows)
    nT = H // TH
    THp = TH + 2 * ph

    # TODO(synk): at production sizes, stream the row halo with a manual DMA
    # (memory_space=pl.ANY + make_async_copy) instead of materializing the
    # padded / overlapping tiles; the overlap here is only (TH+2)/TH.
    xpad = jnp.pad(x, ((0, 0), (ph, ph), (pw, pw), (0, 0)))
    if nT == 1:
        x_tiles = xpad[:, None]
    else:
        rows = jnp.arange(nT)[:, None] * TH + jnp.arange(THp)[None, :]
        x_tiles = xpad[:, rows]                      # (B, nT, THp, Wp, Cin)
    x_tiles = x_tiles.astype(jnp.bfloat16)           # bf16 MXU inputs, f32 accum

    w_k = w.reshape(kh, kw * Cin, Cout).astype(jnp.bfloat16)
    scale_k = scale.reshape(1, Cout).astype(jnp.float32)
    bias_k = bias.reshape(1, Cout).astype(jnp.float32)

    x_spec = pl.BlockSpec((None, None, THp, Wp, Cin), lambda b, t: (b, t, 0, 0, 0))
    w_spec = pl.BlockSpec((kh, kw * Cin, Cout), lambda b, t: (0, 0, 0))
    v_spec = pl.BlockSpec((1, Cout), lambda b, t: (0, 0))
    o_spec = pl.BlockSpec((None, TH, W, Cout), lambda b, t: (b, t, 0, 0))

    in_specs = [x_spec, w_spec, v_spec, v_spec]
    args = [x_tiles, w_k, scale_k, bias_k]
    if residual is None:
        kernel = _conv_bn_silu_kernel
        res_bytes = 0
    else:
        kernel = _conv_bn_silu_res_kernel
        in_specs.append(pl.BlockSpec((None, TH, W, Cout), lambda b, t: (b, t, 0, 0)))
        args.append(residual.astype(jnp.float32))
        res_bytes = TH * W * Cout * 4

    block_bytes = (THp * Wp * Cin * 2 + TH * W * Cout * 4 + res_bytes
                   + kh * kw * Cin * Cout * 2)

    return pl.pallas_call(
        kernel,
        out_shape=jax.ShapeDtypeStruct((B, H, W, Cout), jnp.float32),
        grid=(B, nT),
        in_specs=in_specs,
        out_specs=o_spec,
        compiler_params=_compiler_params(block_bytes),
    )(*args)


# ---------------------------- module forward --------------------------------

def fold_bn(gamma, beta, mean, var, eps=1e-3):
    scale = gamma * jax.lax.rsqrt(var + eps)
    return scale, beta - mean * scale


def concise_bottleneck_forward(x_nchw, params, *, shortcut=True, max_tile_rows=256):
    """x_nchw: (B, Cin, H, W).  Matches ConciseBottleneck.forward (eval-mode BN)."""
    B, Cin, H, W = x_nchw.shape
    Cout = params["w2"].shape[-1]
    use_shortcut = shortcut and (Cin == Cout)

    # TODO(synk): keep NHWC end-to-end in a full model to drop these transposes.
    x = jnp.transpose(x_nchw, (0, 2, 3, 1)).astype(jnp.float32)   # NHWC

    s1, b1 = fold_bn(params["bn1_gamma"], params["bn1_beta"],
                     params["bn1_mean"], params["bn1_var"])
    s2, b2 = fold_bn(params["bn2_gamma"], params["bn2_beta"],
                     params["bn2_mean"], params["bn2_var"])

    h = conv_bn_silu(x, params["w1"], s1, b1, max_tile_rows=max_tile_rows)
    y = conv_bn_silu(h, params["w2"], s2, b2,
                     residual=x if use_shortcut else None,
                     max_tile_rows=max_tile_rows)
    return jnp.transpose(y, (0, 3, 1, 2))


def init_params(key, in_ch, out_ch, expansion=0.5, ksize=(3, 3)):
    mid = int(out_ch * expansion)
    ks = jax.random.split(key, 10)
    wconv = lambda k, shape: 0.05 * jax.random.normal(k, shape, jnp.float32)
    return {
        "w1": wconv(ks[0], (ksize[0], ksize[0], in_ch, mid)),
        "bn1_gamma": 1.0 + 0.1 * jax.random.normal(ks[1], (mid,), jnp.float32),
        "bn1_beta": 0.1 * jax.random.normal(ks[2], (mid,), jnp.float32),
        "bn1_mean": 0.1 * jax.random.normal(ks[3], (mid,), jnp.float32),
        "bn1_var": jax.random.uniform(ks[4], (mid,), jnp.float32, 0.5, 1.5),
        "w2": wconv(ks[5], (ksize[1], ksize[1], mid, out_ch)),
        "bn2_gamma": 1.0 + 0.1 * jax.random.normal(ks[6], (out_ch,), jnp.float32),
        "bn2_beta": 0.1 * jax.random.normal(ks[7], (out_ch,), jnp.float32),
        "bn2_mean": 0.1 * jax.random.normal(ks[8], (out_ch,), jnp.float32),
        "bn2_var": jax.random.uniform(ks[9], (out_ch,), jnp.float32, 0.5, 1.5),
    }


# -------------------------- pure-JAX reference -------------------------------

def _conv_ref(x, w_hwio, stride, pad):
    return jax.lax.conv_general_dilated(
        x, w_hwio, (stride, stride), ((pad, pad), (pad, pad)),
        dimension_numbers=("NCHW", "HWIO", "NCHW"),
        precision=jax.lax.Precision.HIGHEST)


def _bn_silu_ref(x, gamma, beta, mean, var, eps=1e-3):
    inv = (gamma / jnp.sqrt(var + eps)).reshape(1, -1, 1, 1)
    y = (x - mean.reshape(1, -1, 1, 1)) * inv + beta.reshape(1, -1, 1, 1)
    return y * jax.nn.sigmoid(y)


def reference_forward(x, params, shortcut=True):
    Cin, Cout = x.shape[1], params["w2"].shape[-1]
    h = _bn_silu_ref(_conv_ref(x, params["w1"], 1, params["w1"].shape[0] // 2),
                     params["bn1_gamma"], params["bn1_beta"],
                     params["bn1_mean"], params["bn1_var"])
    y = _bn_silu_ref(_conv_ref(h, params["w2"], 1, params["w2"].shape[0] // 2),
                     params["bn2_gamma"], params["bn2_beta"],
                     params["bn2_mean"], params["bn2_var"])
    if shortcut and Cin == Cout:
        y = x + y
    return y


# --------------------------------- main --------------------------------------

if __name__ == "__main__":
    key = jax.random.PRNGKey(0)
    kx1, kx2, kp1, kp2 = jax.random.split(key, 4)

    # Case 1: shortcut bottleneck (in_channel == out_channel), default tiling.
    B, C, H, W = 2, 32, 16, 16
    params1 = init_params(kp1, C, C)
    x1 = jax.random.normal(kx1, (B, C, H, W), jnp.float32)
    out1 = jax.block_until_ready(concise_bottleneck_forward(x1, params1, shortcut=True))
    ref1 = jax.block_until_ready(reference_forward(x1, params1, shortcut=True))
    assert out1.shape == ref1.shape
    np.testing.assert_allclose(np.asarray(out1), np.asarray(ref1),
                               rtol=3e-2, atol=3e-2, err_msg="shortcut")

    # Case 2: same weights/input, force H-tiling (2 tiles) to exercise the
    # overlapping-halo / multi-step grid path.
    out1t = jax.block_until_ready(
        concise_bottleneck_forward(x1, params1, shortcut=True, max_tile_rows=8))
    np.testing.assert_allclose(np.asarray(out1t), np.asarray(ref1),
                               rtol=3e-2, atol=3e-2, err_msg="shortcut-tiled")

    # Case 3: in_channel != out_channel -> no residual (plain kernel variant).
    Cin, Cout = 16, 32
    params2 = init_params(kp2, Cin, Cout)
    x2 = jax.random.normal(kx2, (B, Cin, H, W), jnp.float32)
    out2 = jax.block_until_ready(concise_bottleneck_forward(x2, params2, shortcut=True))
    ref2 = jax.block_until_ready(reference_forward(x2, params2, shortcut=True))
    assert out2.shape == ref2.shape
    np.testing.assert_allclose(np.asarray(out2), np.asarray(ref2),
                               rtol=3e-2, atol=3e-2, err_msg="no-shortcut")

    print("KERNEL_OK")
</pallas_src>

<mosaic_0001>
module attributes {stable_mosaic.version = 11 : i64} {
  func.func @_conv_bn_silu_kernel(%arg0: i32, %arg1: i32, %arg2: memref<1x1x18x18x32xbf16, #tpu.memory_space<vmem>>, %arg3: memref<3x96x16xbf16, #tpu.memory_space<vmem>>, %arg4: memref<1x16xf32, #tpu.memory_space<vmem>>, %arg5: memref<1x16xf32, #tpu.memory_space<vmem>>, %arg6: memref<1x16x16x16xf32, #tpu.memory_space<vmem>>) attributes {dimension_semantics = [#tpu.dimension_semantics<parallel>, #tpu.dimension_semantics<parallel>], iteration_bounds = array<i64: 2, 1>, scalar_prefetch = 0 : i64, scratch_operands = 0 : i64, tpu.core_type = #tpu.core_type<tc>, window_params = [{transform_indices = @transform_0, window_bounds = array<i64: 1, 1, 18, 18, 32>}, {pipeline_mode = #tpu.pipeline_mode<synchronous>, transform_indices = @transform_1, window_bounds = array<i64: 3, 96, 16>}, {pipeline_mode = #tpu.pipeline_mode<synchronous>, transform_indices = @transform_2, window_bounds = array<i64: 1, 16>}, {pipeline_mode = #tpu.pipeline_mode<synchronous>, transform_indices = @transform_3, window_bounds = array<i64: 1, 16>}, {transform_indices = @transform_4, window_bounds = array<i64: 1, 16, 16, 16>}]} {
    %c0 = arith.constant 0 : index
    %c0_0 = arith.constant 0 : index
    %c0_1 = arith.constant 0 : index
    %c0_2 = arith.constant 0 : index
    %c0_3 = arith.constant 0 : index
    %0 = vector.load %arg2[%c0, %c0_0, %c0_1, %c0_2, %c0_3] : memref<1x1x18x18x32xbf16, #tpu.memory_space<vmem>>, vector<1x1x18x18x32xbf16>
    %1 = vector.shape_cast %0 : vector<1x1x18x18x32xbf16> to vector<18x18x32xbf16>
    %c0_4 = arith.constant 0 : index
    %c0_5 = arith.constant 0 : index
    %c0_6 = arith.constant 0 : index
    %2 = vector.load %arg3[%c0_4, %c0_5, %c0_6] : memref<3x96x16xbf16, #tpu.memory_space<vmem>>, vector<3x96x16xbf16>
    %cst = arith.constant 0.000000e+00 : f32
    %3 = vector.broadcast %cst : f32 to vector<256x16xf32>
    %4 = vector.extract_strided_slice %1 {offsets = [0, 0, 0], sizes = [16, 18, 32], strides = [1, 1, 1]} : vector<18x18x32xbf16> to vector<16x18x32xbf16>
    %5 = vector.extract_strided_slice %4 {offsets = [0, 0, 0], sizes = [16, 16, 32], strides = [1, 1, 1]} : vector<16x18x32xbf16> to vector<16x16x32xbf16>
    %6 = vector.extract_strided_slice %4 {offsets = [0, 1, 0], sizes = [16, 16, 32], strides = [1, 1, 1]} : vector<16x18x32xbf16> to vector<16x16x32xbf16>
    %7 = vector.extract_strided_slice %4 {offsets = [0, 2, 0], sizes = [16, 16, 32], strides = [1, 1, 1]} : vector<16x18x32xbf16> to vector<16x16x32xbf16>
    %8 = tpu.concatenate %5, %6, %7 in 2 : vector<16x16x32xbf16>, vector<16x16x32xbf16>, vector<16x16x32xbf16> -> vector<16x16x96xbf16>
    %9 = vector.shape_cast %8 : vector<16x16x96xbf16> to vector<256x96xbf16>
    %10 = vector.extract_strided_slice %2 {offsets = [0, 0, 0], sizes = [1, 96, 16], strides = [1, 1, 1]} : vector<3x96x16xbf16> to vector<1x96x16xbf16>
    %11 = vector.shape_cast %10 : vector<1x96x16xbf16> to vector<96x16xbf16>
    %cst_7 = arith.constant dense<0.000000e+00> : vector<256x16xf32>
    %12 = tpu.matmul %9, %11, %cst_7 {dimension_numbers = #tpu.dot_dimension_numbers<[1], [0], [0], [1], [0, 0, 1, 1], [], []>} : vector<256x96xbf16>, vector<96x16xbf16>, vector<256x16xf32> -> vector<256x16xf32>
    %13 = arith.addf %3, %12 : vector<256x16xf32>
    %14 = vector.extract_strided_slice %1 {offsets = [1, 0, 0], sizes = [16, 18, 32], strides = [1, 1, 1]} : vector<18x18x32xbf16> to vector<16x18x32xbf16>
    %15 = vector.extract_strided_slice %14 {offsets = [0, 0, 0], sizes = [16, 16, 32], strides = [1, 1, 1]} : vector<16x18x32xbf16> to vector<16x16x32xbf16>
    %16 = vector.extract_strided_slice %14 {offsets = [0, 1, 0], sizes = [16, 16, 32], strides = [1, 1, 1]} : vector<16x18x32xbf16> to vector<16x16x32xbf16>
    %17 = vector.extract_strided_slice %14 {offsets = [0, 2, 0], sizes = [16, 16, 32], strides = [1, 1, 1]} : vector<16x18x32xbf16> to vector<16x16x32xbf16>
    %18 = tpu.concatenate %15, %16, %17 in 2 : vector<16x16x32xbf16>, vector<16x16x32xbf16>, vector<16x16x32xbf16> -> vector<16x16x96xbf16>
    %19 = vector.shape_cast %18 : vector<16x16x96xbf16> to vector<256x96xbf16>
    %20 = vector.extract_strided_slice %2 {offsets = [1, 0, 0], sizes = [1, 96, 16], strides = [1, 1, 1]} : vector<3x96x16xbf16> to vector<1x96x16xbf16>
    %21 = vector.shape_cast %20 : vector<1x96x16xbf16> to vector<96x16xbf16>
    %cst_8 = arith.constant dense<0.000000e+00> : vector<256x16xf32>
    %22 = tpu.matmul %19, %21, %cst_8 {dimension_numbers = #tpu.dot_dimension_numbers<[1], [0], [0], [1], [0, 0, 1, 1], [], []>} : vector<256x96xbf16>, vector<96x16xbf16>, vector<256x16xf32> -> vector<256x16xf32>
    %23 = arith.addf %13, %22 : vector<256x16xf32>
    %24 = vector.extract_strided_slice %1 {offsets = [2, 0, 0], sizes = [16, 18, 32], strides = [1, 1, 1]} : vector<18x18x32xbf16> to vector<16x18x32xbf16>
    %25 = vector.extract_strided_slice %24 {offsets = [0, 0, 0], sizes = [16, 16, 32], strides = [1, 1, 1]} : vector<16x18x32xbf16> to vector<16x16x32xbf16>
    %26 = vector.extract_strided_slice %24 {offsets = [0, 1, 0], sizes = [16, 16, 32], strides = [1, 1, 1]} : vector<16x18x32xbf16> to vector<16x16x32xbf16>
    %27 = vector.extract_strided_slice %24 {offsets = [0, 2, 0], sizes = [16, 16, 32], strides = [1, 1, 1]} : vector<16x18x32xbf16> to vector<16x16x32xbf16>
    %28 = tpu.concatenate %25, %26, %27 in 2 : vector<16x16x32xbf16>, vector<16x16x32xbf16>, vector<16x16x32xbf16> -> vector<16x16x96xbf16>
    %29 = vector.shape_cast %28 : vector<16x16x96xbf16> to vector<256x96xbf16>
    %30 = vector.extract_strided_slice %2 {offsets = [2, 0, 0], sizes = [1, 96, 16], strides = [1, 1, 1]} : vector<3x96x16xbf16> to vector<1x96x16xbf16>
    %31 = vector.shape_cast %30 : vector<1x96x16xbf16> to vector<96x16xbf16>
    %cst_9 = arith.constant dense<0.000000e+00> : vector<256x16xf32>
    %32 = tpu.matmul %29, %31, %cst_9 {dimension_numbers = #tpu.dot_dimension_numbers<[1], [0], [0], [1], [0, 0, 1, 1], [], []>} : vector<256x96xbf16>, vector<96x16xbf16>, vector<256x16xf32> -> vector<256x16xf32>
    %33 = arith.addf %23, %32 : vector<256x16xf32>
    %34 = vector.shape_cast %33 : vector<256x16xf32> to vector<16x16x16xf32>
    %c0_10 = arith.constant 0 : index
    %c0_11 = arith.constant 0 : index
    %35 = vector.load %arg4[%c0_10, %c0_11] : memref<1x16xf32, #tpu.memory_space<vmem>>, vector<1x16xf32>
    %36 = vector.shape_cast %35 : vector<1x16xf32> to vector<1x1x16xf32>
    %37 = vector.broadcast %36 : vector<1x1x16xf32> to vector<16x16x16xf32>
    %38 = arith.mulf %34, %37 : vector<16x16x16xf32>
    %c0_12 = arith.constant 0 : index
    %c0_13 = arith.constant 0 : index
    %39 = vector.load %arg5[%c0_12, %c0_13] : memref<1x16xf32, #tpu.memory_space<vmem>>, vector<1x16xf32>
    %40 = vector.shape_cast %39 : vector<1x16xf32> to vector<1x1x16xf32>
    %41 = vector.broadcast %40 : vector<1x1x16xf32> to vector<16x16x16xf32>
    %42 = arith.addf %38, %41 : vector<16x16x16xf32>
    %43 = arith.negf %42 : vector<16x16x16xf32>
    %44 = math.exp %43 : vector<16x16x16xf32>
    %cst_14 = arith.constant 1.000000e+00 : f32
    %45 = vector.broadcast %cst_14 : f32 to vector<16x16x16xf32>
    %46 = arith.addf %45, %44 : vector<16x16x16xf32>
    %47 = arith.divf %45, %46 : vector<16x16x16xf32>
    %48 = arith.mulf %42, %47 : vector<16x16x16xf32>
    %c0_15 = arith.constant 0 : index
    %c0_16 = arith.constant 0 : index
    %c0_17 = arith.constant 0 : index
    %c0_18 = arith.constant 0 : index
    %49 = vector.load %arg6[%c0_15, %c0_16, %c0_17, %c0_18] : memref<1x16x16x16xf32, #tpu.memory_space<vmem>>, vector<1x16x16x16xf32>
    %50 = vector.shape_cast %49 : vector<1x16x16x16xf32> to vector<16x16x16xf32>
    %51 = vector.shape_cast %48 : vector<16x16x16xf32> to vector<1x16x16x16xf32>
    tpu.vector_store %arg6[%c0_15, %c0_16, %c0_17, %c0_18], %51 {strides = array<i32>} : memref<1x16x16x16xf32, #tpu.memory_space<vmem>>, vector<1x16x16x16xf32>,
    return
  }
  func.func @transform_0(%arg0: i32, %arg1: i32) -> (i32, i32, i32, i32, i32) {
    %c0_i32 = arith.constant 0 : i32
    %c0_i32_0 = arith.constant 0 : i32
    %c0_i32_1 = arith.constant 0 : i32
    %c0_i32_2 = arith.constant 0 : i32
    return %arg0, %arg1, %c0_i32, %c0_i32_0, %c0_i32_1 : i32, i32, i32, i32, i32
  }
  func.func @transform_1(%arg0: i32, %arg1: i32) -> (i32, i32, i32) {
    %c0_i32 = arith.constant 0 : i32
    %c0_i32_0 = arith.constant 0 : i32
    %c0_i32_1 = arith.constant 0 : i32
    %c0_i32_2 = arith.constant 0 : i32
    return %c0_i32, %c0_i32_0, %c0_i32_1 : i32, i32, i32
  }
  func.func @transform_2(%arg0: i32, %arg1: i32) -> (i32, i32) {
    %c0_i32 = arith.constant 0 : i32
    %c0_i32_0 = arith.constant 0 : i32
    %c0_i32_1 = arith.constant 0 : i32
    return %c0_i32, %c0_i32_0 : i32, i32
  }
  func.func @transform_3(%arg0: i32, %arg1: i32) -> (i32, i32) {
    %c0_i32 = arith.constant 0 : i32
    %c0_i32_0 = arith.constant 0 : i32
    %c0_i32_1 = arith.constant 0 : i32
    return %c0_i32, %c0_i32_0 : i32, i32
  }
  func.func @transform_4(%arg0: i32, %arg1: i32) -> (i32, i32, i32, i32) {
    %c0_i32 = arith.constant 0 : i32
    %c0_i32_0 = arith.constant 0 : i32
    %c0_i32_1 = arith.constant 0 : i32
    return %arg0, %arg1, %c0_i32, %c0_i32_0 : i32, i32, i32, i32
  }
}

</mosaic_0001>

<bundles_post_ra>
// kernel: tpu_custom_call.1
= control target key start
LH: loop header
LB: loop body
LE: loop exit
PB: predicated region body
PF: predicated region fallthrough
CT: control target
= control target key end

     0   :  { %9 = vsyncpa [#allocation3], 0  ;;  %s3870_s0 = inlined_call_operand.vmem [shape: bf16[2,1,18,18,32], index: 0, kind: input, shape index: {}]   ;;  %s3871_s1 = inlined_call_operand.vmem [shape: bf16[3,96,16], index: 1, kind: input, shape index: {}]   ;;  %s3872_s2 = inlined_call_operand.vmem [shape: f32[1,16], index: 2, kind: input, shape index: {}]   ;;  %s3873_s3 = inlined_call_operand.vmem [shape: f32[1,16], index: 3, kind: input, shape index: {}]   ;;  %s3874_s4 = inlined_call_operand.hbm [shape: f32[2,16,16,16], index: 4, kind: output, shape index: {}]  }
   0x1   :  { %11 = vsyncpa [#allocation3 + $0x1], 0  ;;  %s2760_s15 = smov 0   ;;  %s2762_s16 = smov 0  }
   0x2   :  { %s2764_s17 = smov 0   ;;  %s2766_s18 = smov 0  }
   0x3   :  { %s2768_s19 = smov 0   ;;  %s2770_s20 = smov 0  }
   0x4 LB: > { %s2168_s21 = sadd.s32 4294967295, %s2729_s20   ;;  %s2169_s22 = sadd.s32 4294967294, %s2729_s20   ;;  %s2729_s20 = sphi %s2770_s20, %s17_s20   ;;  %s2725_s19 = sphi %s2768_s19, %s3899_s19   ;;  %s2721_s18 = sphi %s2766_s18, %s3898_s18   ;;  %s2717_s17 = sphi %s2764_s17, %s3897_s17   ;;  %s2713_s16 = sphi %s2762_s16, %s3896_s16   ;;  %s2709_s15 = sphi %s2760_s15, %s3895_s15  }
   0x5   : > { %s29_s23 = sadd.s32 1, %s2725_s19  ;;  %s129_s24 = sadd.s32 1, %s2717_s17 }
   0x6   : > { %p31_p0 = scmp.ge.s32.totalorder %s29_s23, 2  ;;  %p139_p1 = scmp.ne.s32.totalorder %s2717_s17, %s2713_s16 }
   0x7   : > { %p140_p2 = scmp.eq.s32.totalorder %s2168_s21, 1  ;;  %p145_p3 = scmp.ne.s32.totalorder %s2713_s16, %s2709_s15 }
   0x8   : > { %s3901_s23 = smov (%p31_p0, %s29_s23), 0  ;;  %p146_p5 = scmp.eq.s32.totalorder %s2169_s22, 1 }
   0x9   : > { %p2800_p4 = por %p140_p2, %p139_p1  ;;  %s124_s26 = ssub.s32 %s2725_s19, %s3901_s23 }
   0xa   : > { %p2172_p6 = scmp.ge.s32.totalorder %s2729_s20, 1  ;;  %p127_p7 = scmp.eq.s32.totalorder %s124_s26, 0 }
   0xb   : > { %p2807_p8 = por %p146_p5, %p145_p3  ;;  %p185_p9 = scmp.lt.s32.totalorder %s2729_s20, 3 }
   0xc   : > { %s2813_s28 = scalar_select %p127_p7, %s2717_s17, %s129_s24  }
   0xd   : > { %p186_p10 = pnand %p2172_p6, %p185_p9 }
   0xe   : > { %p215_p11 = scmp.lt.s32.totalorder (!%p186_p10), %s2721_s18, 1  ;;  %s2731_s8 = smov (!%p186_p10), 64  }
   0xf   : > { %189 = sbr.rel (%p186_p10) target bundleno = 534 (0x216), region = 36  ;;  %s2732_s9 = smov (!%p186_p10), 32  }
  0x10   : > { %s212_s5 = sand.u32 (!%p186_p10), 1, %s2713_s16   ;;  %s2440_s21 = sshll.u32 (!%p186_p10), %s2721_s18, 8 }
  0x11   : > { %s2173_s6 = sshll.u32 (!%p186_p10), %s212_s5, 8  ;;  %s2671_s11 = scalar_lea.hbm (!%p186_p10), %s3874_s4, 512 }
  0x12   : > { %s3307_s10 = scalar_lea.vmem (!%p186_p10), [#allocation2], %s2173_s6 }
  0x13   : > { %s2083_s26 = sshll.u32 (!%p186_p10), %s3307_s10, 4  ;;  %s2084_s26 = int_to_ptr.vmem [resolvable:$true] %s2083_s26 }
  0x14   : > { %s216_s29 = scalar_select %p215_p11, %s2721_s18, 1  ;;  %vm669_vm0 = vcmask 1046528   ;;  %vm444_vm1 = vsmask.f32 7424  ;;  %vm750_vm2 = vcmask 261120   ;;  %vm783_vm3 = vcmask 523264  }
  0x15   : > { %vm883_vm4 = vcmask 785408   ;;  %vm2034_vm9 = vcmask 130048   ;;  %s2082_s18 = scalar_lea.hbm %s3874_s4, %s2440_s21 }
  0x16   : > { %s2459_s30 = smul.u32 216, %s216_s29  ;;  %s2085_s29 = sshll.u32 %s2082_s18, 4  ;;  %s2086_s29 = int_to_ptr.hbm [resolvable:$true] %s2085_s29 }
  0x18   : > { %s2820_s7 = scalar_lea.vmem %s3870_s0, %s2459_s30 }
  0x19   : > { %v2823_v0 = vld [vmem:[%s2820_s7 + $0x18] sm:$0xff]  ;;  %v234_v1 = vld [vmem:[%s2820_s7 + $0x20] sm:$0x1]  ;;  %v267_v4 = vld [vmem:[%s2820_s7 + $0xa4] sm:$0x1] }
  0x1a   : > { %v2827_v2 = vld [vmem:[%s2820_s7 + $0x9c] sm:$0xff]  ;;  %v414_v3 = vunpack.c.l.b16 %v234_v1  ;;  %v470_v5 = vshrl.u32 %v2823_v0, 16  ;;  %v472_v6 = vshll.u32 %v2823_v0, 16  ;;  %v425_v7 = vunpack.c.l.b16 %v267_v4  ;;  %v228_v11 = vld [vmem:[%s2820_s7 + $0x8] sm:$0x1]  ;;  %v2851_v38 = vld [vmem:[%s2820_s7 + $0xc] sm:$0xff] }
  0x1b   : > { %v676_v9 = vrot.slane %v2823_v0, 1  ;;  %v604_v10 = vshll.u32 %v2827_v2, 16  ;;  %v602_v17 = vshrl.u32 %v2827_v2, 16  ;;  %v231_v18 = vld [vmem:[%s2820_s7 + $0x14] sm:$0x1]  ;;  %v412_v19 = vunpack.c.l.b16 %v228_v11  ;;  %v2843_v28 = vld [vmem:[%s2820_s7] sm:$0xff] }
  0x1c   : > { %v430_v8 = vpack.c.b16 %v414_v3, %v414_v3  ;;  %v474_v12 = vrot.slane %v472_v6, 1  ;;  %v441_v13 = vpack.c.b16 %v425_v7, %v425_v7  ;;  %v709_v25 = vrot.slane %v2827_v2, 1  ;;  %v237_v32 = vld [vmem:[%s2820_s7 + $0x2c] sm:$0x1]  ;;  %v270_v33 = vld [vmem:[%s2820_s7 + $0xb0] sm:$0x1] }
  0x1d   : > { %v606_v22 = vrot.slane %v604_v10, 1  ;;  %v413_v27 = vunpack.c.l.b16 %v231_v18  ;;  %v428_v29 = vpack.c.b16 %v412_v19, %v412_v19  ;;  %v446_v34 = vshrl.u32 %v2843_v28, 16  ;;  %v2855_v44 = vld [vmem:[%s2820_s7 + $0xa8] sm:$0xff]  ;;  %v273_v57 = vld [vmem:[%s2820_s7 + $0xbc] sm:$0x1]  ;;  %v2876_v4 = vld [vmem:[%s2820_s7 + $0xb4] sm:$0xff] }
  0x1e   : > { %v677_v14 = vrot.slane %v430_v8, 1  ;;  %v477_v15 = vshll.u32 %v430_v8, 16  ;;  %v475_v16 = vor.u32 %v474_v12, %v470_v5  ;;  %v609_v23 = vshll.u32 %v441_v13, 16  ;;  %v2864_v54 = vld [vmem:[%s2820_s7 + $0x24] sm:$0xff]  ;;  %v240_v61 = vld [vmem:[%s2820_s7 + $0x38] sm:$0x1] }
  0x1f   : > { %v710_v26 = vrot.slane %v441_v13, 1  ;;  %v607_v30 = vor.u32 %v606_v22, %v602_v17  ;;  %v448_v35 = vshll.u32 %v2843_v28, 16  ;;  %v453_v36 = vshll.u32 %v428_v29, 16  ;;  %v2883_v12 = vld [vmem:[%s2820_s7 + $0x30] sm:$0xff] }
  0x20   : > { %v678_v20 = vsel %vm669_vm0, %v676_v9, %v677_v14  ;;  %v479_v21 = vrot.slane %v477_v15, 1  ;;  %v611_v31 = vrot.slane %v609_v23, 1  ;;  %v429_v39 = vpack.c.b16 %v413_v27, %v413_v27 }
  0x21   : > { %722 = vrot.lane.b32.xlu1 %v678_v20, %s2731_s8  ;;  %v711_v37 = vsel %vm669_vm0, %v709_v25, %v710_v26  ;;  %v450_v40 = vrot.slane %v448_v35, 1  ;;  %v455_v41 = vrot.slane %v453_v36, 1  ;;  %v415_v43 = vunpack.c.l.b16 %v237_v32  ;;  %v243_v20 = vld [vmem:[%s2820_s7 + $0x44] sm:$0x1]  ;;  %v2899_v32 = vld [vmem:[%s2820_s7 + $0x3c] sm:$0xff] }
  0x22   : > { %v480_v24 = vsel %vm444_vm1, %v475_v16, %v479_v21  ;;  %v612_v42 = vsel %vm444_vm1, %v607_v30, %v611_v31  ;;  %v426_v45 = vunpack.c.l.b16 %v270_v33  ;;  %v458_v47 = vshrl.u32 %v2851_v38, 16 }
  0x23   : > { %641 = vrot.lane.b32.xlu0 %v480_v24, %s2732_s9  ;;  %v451_v46 = vor.u32 %v450_v40, %v446_v34  ;;  %v460_v48 = vshll.u32 %v2851_v38, 16  ;;  %v673_v49 = vrot.slane %v2851_v38, 1  ;;  %v674_v50 = vrot.slane %v429_v39, 1 }
  0x24   : > { %v465_v51 = vshll.u32 %v429_v39, 16  ;;  %v670_v52 = vrot.slane %v2843_v28, 1  ;;  %v671_v53 = vrot.slane %v428_v29, 1  ;;  %v431_v58 = vpack.c.b16 %v415_v43, %v415_v43 }
  0x25   : > { %v456_v55 = vsel %vm444_vm1, %v451_v46, %v455_v41  ;;  %v462_v56 = vrot.slane %v460_v48, 1  ;;  %v2868_v59 = vpack.c.b16 %v426_v45, %v426_v45  ;;  %v616_v60 = vshll.u32 %v2855_v44, 16 }
  0x26   : > { %637 = vrot.lane.b32.xlu2 %v456_v55, %s2732_s9  ;;  %v467_v63 = vrot.slane %v465_v51, 1  ;;  %v484_v1 = vshll.u32 %v2864_v54, 16  ;;  %v675_v3 = vsel %vm669_vm0, %v673_v49, %v674_v50  ;;  %v427_v5 = vunpack.c.l.b16 %v273_v57 }
  0x27   : > { %v463_v62 = vor.u32 %v462_v56, %v458_v47  ;;  %v672_v6 = vsel %vm669_vm0, %v670_v52, %v671_v53  ;;  %v679_v7 = vrot.slane %v2864_v54, 1  ;;  %v614_v8 = vshrl.u32 %v2855_v44, 16  ;;  %v276_v53 = vld [vmem:[%s2820_s7 + $0xc8] sm:$0x1] }
  0x28   : > { %v680_v9 = vrot.slane %v431_v58, 1  ;;  %v618_v10 = vrot.slane %v616_v60, 1  ;;  %v621_v11 = vshll.u32 %v2868_v59, 16  ;;  %v416_v13 = vunpack.c.l.b16 %v240_v61  ;;  %v2926_v61 = vld [vmem:[%s3871_s1 + $0x88] sm:$0xff] }
  0x29   : > { %744 = vrot.lane.b32.xlu1 %v711_v37, %s2731_s8  ;;  %v468_v14 = vsel %vm444_vm1, %v463_v62, %v467_v63  ;;  %v482_v15 = vshrl.u32 %v2864_v54, 16  ;;  %v486_v16 = vrot.slane %v484_v1, 1  ;;  %v489_v17 = vshll.u32 %v431_v58, 16  ;;  %v2433_v1 = vld [vmem:[%s3871_s1 + $0x58] sm:$0xff]  ;;  %1203 = vmatpush.bf16.msra.mxu2 %v2926_v61 }
  0x2a   : > { %v2888_v18 = vpack.c.b16 %v427_v5, %v427_v5  ;;  %v628_v19 = vshll.u32 %v2876_v4, 16  ;;  %v619_v21 = vor.u32 %v618_v10, %v614_v8  ;;  %v623_v22 = vrot.slane %v621_v11, 1  ;;  %v2941_v8 = vld [vmem:[%s3871_s1 + $0x80] sm:$0xff]  ;;  %2441 = vmatpush.bf16.msra.mxu3 %v2433_v1  ;;  %918 = vmatpush.bf16.msra.mxu0 %v2433_v1  ;;  %v246_v11 = vld [vmem:[%s2820_s7 + $0x50] sm:$0x1] }
  0x2b   : > { %663 = vrot.lane.b32.xlu0 %v612_v42, %s2732_s9  ;;  %v432_v23 = vpack.c.b16 %v416_v13, %v416_v13  ;;  %v496_v24 = vshll.u32 %v2883_v12, 16  ;;  %v681_v25 = vsel %vm669_vm0, %v679_v7, %v680_v9  ;;  %v487_v26 = vor.u32 %v486_v16, %v482_v15 }
  0x2c   : > { %v491_v27 = vrot.slane %v489_v17, 1  ;;  %v626_v29 = vshrl.u32 %v2876_v4, 16  ;;  %v630_v30 = vrot.slane %v628_v19, 1  ;;  %v633_v31 = vshll.u32 %v2888_v18, 16 }
  0x2d   : > { %v417_v33 = vunpack.c.l.b16 %v243_v20  ;;  %v624_v34 = vsel %vm444_vm1, %v619_v21, %v623_v22  ;;  %v494_v35 = vshrl.u32 %v2883_v12, 16  ;;  %v498_v36 = vrot.slane %v496_v24, 1  ;;  %1204 = vmatpush.bf16.msra.mxu2 %v2941_v8  ;;  %v2956_v20 = vld [vmem:[%s3871_s1 + $0x78] sm:$0xff] }
  0x2e   : > { %639 = vrot.lane.b32.xlu2 %v468_v14, %s2732_s9  ;;  %v501_v37 = vshll.u32 %v432_v23, 16  ;;  %v492_v39 = vsel %vm444_vm1, %v487_v26, %v491_v27  ;;  %v631_v40 = vor.u32 %v630_v30, %v626_v29  ;;  %v635_v41 = vrot.slane %v633_v31, 1  ;;  %v2947_v14 = vld [vmem:[%s2820_s7 + $0x90] sm:$0xff]  ;;  %v2963_v26 = vld [vmem:[%s2820_s7 + $0x48] sm:$0xff] }
  0x2f   : > { %v2905_v42 = vpack.c.b16 %v417_v33, %v417_v33  ;;  %v508_v43 = vshll.u32 %v2899_v32, 16  ;;  %v499_v45 = vor.u32 %v498_v36, %v494_v35  ;;  %v712_v47 = vrot.slane %v2855_v44, 1  ;;  %v2432_v27 = vld [vmem:[%s3871_s1 + $0x50] sm:$0xff]  ;;  %v2971_v29 = vld [vmem:[%s3871_s1 + $0x28] sm:$0xff]  ;;  %v249_v35 = vld [vmem:[%s2820_s7 + $0x5c] sm:$0x1] }
  0x30   : > { %v503_v46 = vrot.slane %v501_v37, 1  ;;  %v713_v48 = vrot.slane %v2868_v59, 1  ;;  %v636_v49 = vsel %vm444_vm1, %v631_v40, %v635_v41  ;;  %v506_v50 = vshrl.u32 %v2899_v32, 16  ;;  %v2921_v59 = vld [vmem:[%s2820_s7 + $0xc0] sm:$0xff]  ;;  %2442 = vmatpush.bf16.msra.mxu3 %v2432_v27  ;;  %v2983_v37 = vld [vmem:[%s3871_s1 + $0x70] sm:$0xff]  ;;  %1045 = vmatpush.bf16.msra.mxu1 %v2971_v29  ;;  %v2431_v41 = vld [vmem:[%s3871_s1 + $0x48] sm:$0xff] }
  0x31   : > { %720 = vrot.lane.b32.xlu1 %v675_v3, %s2731_s8  ;;  %v510_v51 = vrot.slane %v508_v43, 1  ;;  %v513_v52 = vshll.u32 %v2905_v42, 16  ;;  %v822_v60 = vunpack.c.l.b16 %v276_v53  ;;  %v715_v62 = vrot.slane %v2876_v4, 1  ;;  %1205 = vmatpush.bf16.msra.mxu2 %v2956_v20  ;;  %v3003_v53 = vld [vmem:[%s3871_s1 + $0x68] sm:$0xff] }
  0x32   : > { %v504_v55 = vsel %vm444_vm1, %v499_v45, %v503_v46  ;;  %v714_v56 = vsel %vm669_vm0, %v712_v47, %v713_v48  ;;  %v716_v63 = vrot.slane %v2888_v18, 1  ;;  %v682_v3 = vrot.slane %v2883_v12, 1  ;;  %919 = vmatpush.bf16.msra.mxu0 %v2432_v27  ;;  %v2994_v47 = vld [vmem:[%s2820_s7 + $0x54] sm:$0xff] }
  0x33   : > { %718 = vrot.lane.b32.xlu0 %v672_v6, %s2731_s8  ;;  %v511_v57 = vor.u32 %v510_v51, %v506_v50  ;;  %v515_v58 = vrot.slane %v513_v52, 1  ;;  %v683_v5 = vrot.slane %v432_v23, 1  ;;  %v264_v6 = vld [vmem:[%s2820_s7 + $0x98] sm:$0x1]  ;;  %v827_v7 = vshll.u32 %v2921_v59, 16 }
  0x34   : > { %v823_v10 = vpack.c.b16 %v822_v60, %v822_v60  ;;  %v717_v13 = vsel %vm669_vm0, %v715_v62, %v716_v63  ;;  %v424_v15 = vunpack.c.l.b16 %v264_v6  ;;  %v825_v17 = vshrl.u32 %v2921_v59, 16  ;;  %2443 = vmatpush.bf16.msra.mxu3 %v2431_v41 }
  0x35   : > { %v516_v9 = vsel %vm444_vm1, %v511_v57, %v515_v58  ;;  %v684_v16 = vsel %vm669_vm0, %v682_v3, %v683_v5  ;;  %v829_v18 = vrot.slane %v827_v7, 1  ;;  %v838_v21 = vrot.slane %v2921_v59, 1  ;;  %1206 = vmatpush.bf16.msra.mxu2 %v2983_v37 }
  0x36   : > { %643 = vrot.lane.b32.xlu2 %v492_v39, %s2732_s9  ;;  %v832_v19 = vshll.u32 %v823_v10, 16  ;;  %v839_v22 = vrot.slane %v823_v10, 1  ;;  %v418_v23 = vunpack.c.l.b16 %v246_v11  ;;  %v685_v24 = vrot.slane %v2899_v32, 1  ;;  %920 = vmatpush.bf16.msra.mxu0 %v2431_v41  ;;  %v252_v11 = vld [vmem:[%s2820_s7 + $0x68] sm:$0x1]  ;;  %v2426_v41 = vld [vmem:[%s3871_s1 + $0x20] sm:$0xff] }
  0x37   : > { %v2974_v30 = vpack.c.b16 %v424_v15, %v424_v15  ;;  %v592_v31 = vshll.u32 %v2947_v14, 16  ;;  %v830_v33 = vor.u32 %v829_v18, %v825_v17  ;;  %v520_v36 = vshll.u32 %v2963_v26, 16  ;;  %1046 = vmatpush.bf16.msra.mxu1 %v2426_v41 }
  0x38   : > { %v840_v39 = vsel %vm669_vm0, %v838_v21, %v839_v22  ;;  %v434_v40 = vpack.c.b16 %v418_v23, %v418_v23  ;;  %v590_v43 = vshrl.u32 %v2947_v14, 16  ;;  %v419_v48 = vunpack.c.l.b16 %v249_v35  ;;  %v3035_v35 = vld [vmem:[%s2820_s7 + $0x6c] sm:$0xff] }
  0x39   : > { %724 = vrot.lane.b32.xlu1 %v681_v25, %s2731_s8  ;;  %v686_v25 = vrot.slane %v2905_v42, 1  ;;  %v594_v45 = vrot.slane %v592_v31, 1  ;;  %v597_v46 = vshll.u32 %v2974_v30, 16  ;;  %v518_v50 = vshrl.u32 %v2963_v26, 16  ;;  %1207 = vmatpush.bf16.msra.mxu2 %v3003_v53 }
  0x3a   : > { %v522_v51 = vrot.slane %v520_v36, 1  ;;  %v525_v52 = vshll.u32 %v434_v40, 16  ;;  %v435_v60 = vpack.c.b16 %v419_v48, %v419_v48  ;;  %v532_v62 = vshll.u32 %v2994_v47, 16 }
  0x3b   : > { %665 = vrot.lane.b32.xlu0 %v624_v34, %s2732_s9  ;;  %v834_v34 = vrot.slane %v832_v19, 1  ;;  %v687_v42 = vsel %vm669_vm0, %v685_v24, %v686_v25  ;;  %v595_v57 = vor.u32 %v594_v45, %v590_v43  ;;  %v599_v58 = vrot.slane %v597_v46, 1  ;;  %v3024_v24 = vld [vmem:[%s2820_s7 + $0x60] sm:$0xff] }
  0x3c   : > { %v523_v63 = vor.u32 %v522_v51, %v518_v50  ;;  %v527_v1 = vrot.slane %v525_v52, 1  ;;  %v530_v6 = vshrl.u32 %v2994_v47, 16  ;;  %v534_v7 = vrot.slane %v532_v62, 1  ;;  %v3049_v43 = vld [vmem:[%s3871_s1 + $0x60] sm:$0xff]  ;;  %v2425_v51 = vld [vmem:[%s3871_s1 + $0x18] sm:$0xff] }
  0x3d   : > { %v600_v5 = vsel %vm444_vm1, %v595_v57, %v599_v58  ;;  %v692_v15 = vrot.slane %v435_v60, 1  ;;  %v420_v18 = vunpack.c.l.b16 %v252_v11  ;;  %v706_v19 = vrot.slane %v2947_v14, 1  ;;  %1208 = vmatpush.bf16.msra.mxu2 %v3049_v43  ;;  %1047 = vmatpush.bf16.msra.mxu1 %v2425_v51  ;;  %v2424_v57 = vld [vmem:[%s3871_s1 + $0x10] sm:$0xff] }
  0x3e   : > { %746 = vrot.lane.b32.xlu2 %v714_v56, %s2731_s8  ;;  %v689_v56 = vrot.slane %v434_v40, 1  ;;  %v528_v10 = vsel %vm444_vm1, %v523_v63, %v527_v1  ;;  %v707_v21 = vrot.slane %v2974_v30, 1  ;;  %v694_v31 = vrot.slane %v3024_v24, 1  ;;  %v2428_v58 = vld [vmem:[%s3871_s1 + $0x30] sm:$0xff] }
  0x3f   : > { %v436_v25 = vpack.c.b16 %v420_v18, %v420_v18  ;;  %v556_v40 = vshll.u32 %v3035_v35, 16  ;;  %v554_v45 = vshrl.u32 %v3035_v35, 16 }
  0x40   : > { %v708_v27 = vsel %vm669_vm0, %v706_v19, %v707_v21 }
  0x41   : > { %667 = vrot.lane.b32.xlu1 %v636_v49, %s2732_s9  ;;  %v835_v49 = vsel %vm444_vm1, %v830_v33, %v834_v34  ;;  %v695_v33 = vrot.slane %v436_v25, 1  ;;  %v255_v34 = vld [vmem:[%s2820_s7 + $0x74] sm:$0x1]  ;;  %v558_v46 = vrot.slane %v556_v40, 1  ;;  %v549_v63 = vshll.u32 %v436_v25, 16  ;;  %1048 = vmatpush.bf16.msra.mxu1 %v2424_v57 }
  0x42   : > { %v421_v36 = vunpack.c.l.b16 %v255_v34  ;;  %v261_v34 = vld [vmem:[%s2820_s7 + $0x8c] sm:$0x1] }
  0x43   : > { %645 = vrot.lane.b32.xlu0 %v504_v55, %s2732_s9  ;;  %v688_v55 = vrot.slane %v2963_v26, 1  ;;  %v696_v30 = vsel %vm669_vm0, %v694_v31, %v695_v33  ;;  %v697_v31 = vrot.slane %v3035_v35, 1 }
  0x45   : > { %v690_v3 = vsel %vm669_vm0, %v688_v55, %v689_v56  ;;  %v2429_v55 = vld [vmem:[%s3871_s1 + $0x38] sm:$0xff]  ;;  %v544_v56 = vshll.u32 %v3024_v24, 16 }
  0x46   : > { %726 = vrot.lane.b32.xlu2 %v684_v16, %s2731_s8  ;;  %v535_v16 = vor.u32 %v534_v7, %v530_v6  ;;  %v258_v6 = vld [vmem:[%s2820_s7 + $0x80] sm:$0x1] }
  0x47   : > { %v546_v62 = vrot.slane %v544_v56, 1 }
  0x49   : > { %647 = vrot.lane.b32.xlu1 %v516_v9, %s2732_s9  ;;  %v537_v9 = vshll.u32 %v435_v60, 16  ;;  %v542_v60 = vshrl.u32 %v3024_v24, 16 }
  0x4b   : > { %748 = vrot.lane.b32.xlu0 %v717_v13, %s2731_s8  ;;  %v691_v13 = vrot.slane %v2994_v47, 1  ;;  %v539_v17 = vrot.slane %v537_v9, 1  ;;  %v547_v1 = vor.u32 %v546_v62, %v542_v60  ;;  %v3077_v9 = vld [vmem:[%s2820_s7 + $0x78] sm:$0xff] }
  0x4c   : > { %v700_v21 = vrot.slane %v3077_v9, 1 }
  0x4d   : > { %v693_v22 = vsel %vm669_vm0, %v691_v13, %v692_v15  ;;  %v540_v23 = vsel %vm444_vm1, %v535_v16, %v539_v17  ;;  %v568_v13 = vshll.u32 %v3077_v9, 16  ;;  %v2422_v15 = vld [vmem:[%s3871_s1] sm:$0xff]  ;;  %v566_v16 = vshrl.u32 %v3077_v9, 16 }
  0x4e   : > { %836 = vrot.lane.b32.xlu2 %v835_v49, %s2732_s9  ;;  %v559_v49 = vor.u32 %v558_v46, %v554_v45 }
  0x51   : > { %841 = vrot.lane.b32.xlu1 %v840_v39, %s2731_s8  ;;  %v3037_v39 = vpack.c.b16 %v421_v36, %v421_v36  ;;  %v423_v36 = vunpack.c.l.b16 %v261_v34 }
  0x53   : > { %728 = vrot.lane.b32.xlu0 %v687_v42, %s2731_s8  ;;  %v2430_v42 = vld [vmem:[%s3871_s1 + $0x40] sm:$0xff]  ;;  %v561_v48 = vshll.u32 %v3037_v39, 16  ;;  %v698_v33 = vrot.slane %v3037_v39, 1 }
  0x54   : > { %2444 = vmatpush.bf16.msra.mxu3 %v2430_v42  ;;  %921 = vmatpush.bf16.msra.mxu0 %v2430_v42  ;;  %v439_v42 = vpack.c.b16 %v423_v36, %v423_v36 }
  0x55   : > { %v563_v50 = vrot.slane %v561_v48, 1 }
  0x56   : > { %649 = vrot.lane.b32.xlu2 %v528_v10, %s2732_s9  ;;  %v422_v10 = vunpack.c.l.b16 %v258_v6  ;;  %v704_v48 = vrot.slane %v439_v42, 1  ;;  %v585_v6 = vshll.u32 %v439_v42, 16 }
  0x57   : > { %v564_v52 = vsel %vm444_vm1, %v559_v49, %v563_v50 }
  0x58   : > { %2445 = vmatpush.bf16.msra.mxu3 %v2429_v55  ;;  %922 = vmatpush.bf16.msra.mxu0 %v2429_v55  ;;  %v438_v11 = vpack.c.b16 %v422_v10, %v422_v10 }
  0x59   : > { %730 = vrot.lane.b32.xlu1 %v690_v3, %s2731_s8  ;;  %v551_v3 = vrot.slane %v549_v63, 1 }
  0x5a   : > { %v573_v17 = vshll.u32 %v438_v11, 16 }
  0x5b   : > { %661 = vrot.lane.b32.xlu0 %v600_v5, %s2732_s9  ;;  %v2423_v5 = vld [vmem:[%s3871_s1 + $0x8] sm:$0xff]  ;;  %v552_v7 = vsel %vm444_vm1, %v547_v1, %v551_v3 }
  0x5c   : > { %2446 = vmatpush.bf16.msra.mxu3 %v2428_v58  ;;  %923 = vmatpush.bf16.msra.mxu0 %v2428_v58  ;;  %v575_v19 = vrot.slane %v573_v17, 1 }
  0x5d   : > { %1049 = vmatpush.bf16.msra.mxu1 %v2423_v5 }
  0x5e   : > { %742 = vrot.lane.b32.xlu2 %v708_v27, %s2731_s8 }
  0x60   : > { %2447 = vmatpush.bf16.msrb.mxu3 %v2971_v29  ;;  %v570_v29 = vrot.slane %v568_v13, 1  ;;  %v587_v13 = vrot.slane %v585_v6, 1 }
  0x61   : > { %732 = vrot.lane.b32.xlu1 %v693_v22, %s2731_s8  ;;  %1050 = vmatpush.bf16.msra.mxu1 %v2422_v15  ;;  %v701_v22 = vrot.slane %v438_v11, 1 }
  0x62   : > { %v571_v18 = vor.u32 %v570_v29, %v566_v16  ;;  %v279_v16 = vld [vmem:[%s2820_s7 + $0xd4] sm:$0x1]  ;;  %v3145_v29 = vld [vmem:[%s2820_s7 + $0xcc] sm:$0xff] }
  0x63   : > { %651 = vrot.lane.b32.xlu0 %v540_v23, %s2732_s9  ;;  %v702_v25 = vsel %vm669_vm0, %v700_v21, %v701_v22  ;;  %v1138_v17 = vunpack.c.l.b16 %v279_v16  ;;  %v1141_v21 = vshrl.u32 %v3145_v29, 16 }
  0x64   : > { %2448 = vmatpush.bf16.msrb.mxu3 %v2426_v41  ;;  %v576_v23 = vsel %vm444_vm1, %v571_v18, %v575_v19  ;;  %v3096_v41 = vld [vmem:[%s2820_s7 + $0x84] sm:$0xff]  ;;  %v1143_v18 = vshll.u32 %v3145_v29, 16  ;;  %s2068_s7 = scalar_lea.sflag [#allocation3], %s212_s5 }
  0x65   : > { %v703_v39 = vrot.slane %v3096_v41, 1 }
  0x66   : > { %653 = vrot.lane.b32.xlu2 %v552_v7, %s2732_s9  ;;  %v1145_v22 = vrot.slane %v1143_v18, 1 }
  0x68   : > { %2449 = vmatpush.bf16.msrb.mxu3 %v2425_v51  ;;  %v705_v51 = vsel %vm669_vm0, %v703_v39, %v704_v48 }
  0x69   : > { %655 = vrot.lane.b32.xlu1 %v564_v52, %s2732_s9 }
  0x6b   : > { %734 = vrot.lane.b32.xlu0 %v696_v30, %s2731_s8  ;;  %v699_v30 = vsel %vm669_vm0, %v697_v31, %v698_v33 }
  0x6c   : > { %2450 = vmatpush.bf16.msrb.mxu3 %v2424_v57 }
  0x6e   : > { %736 = vrot.lane.b32.xlu2 %v699_v30, %s2731_s8 }
  0x70   : > { %2451 = vmatpush.bf16.msrb.mxu3 %v2423_v5 }
  0x71   : > { %738 = vrot.lane.b32.xlu1 %v702_v25, %s2731_s8 }
  0x73   : > { %657 = vrot.lane.b32.xlu0 %v576_v23, %s2732_s9 }
  0x74   : > { %2452 = vmatpush.bf16.msrb.mxu3 %v2422_v15 }
  0x7b   : > { %740 = vrot.lane.b32.xlu0 %v705_v51, %s2731_s8 }
  0x80   : > { %v638_v27 = vpop.permute.xlu2 %637 }
  0x81   : > { %v752_v63 = vsel %vm750_vm2, %v2843_v28, %v638_v27  ;;  %v578_v28 = vshrl.u32 %v3096_v41, 16  ;;  %v1146_v27 = vor.u32 %v1145_v22, %v1141_v21 }
  0x88   : > { %v640_v50 = vpop.permute.xlu2 %639 }
  0x89   : > { %v754_v57 = vsel %vm750_vm2, %v2851_v38, %v640_v50 }
  0x90   : > { %v644_v58 = vpop.permute.xlu2 %643 }
  0x91   : > { %v758_v38 = vsel %vm750_vm2, %v2864_v54, %v644_v58 }
  0x93   : > { %v723_v40 = vpop.permute.xlu1 %722 }
  0x95   : > { %v642_v45 = vpop.permute.xlu0 %641 }
  0x96   : > { %v756_v46 = vsel %vm750_vm2, %v2823_v0, %v642_v45 }
  0x97   : > { %v3102_v49 = vsel %vm783_vm3, %v756_v46, %v723_v40 }
  0x98   : > { %2351 = vmatmul.msk.bf16.vlgmr.msra.gmra.mxu2 %vm883_vm4, %v3102_v49  ;;  %v747_v7 = vpop.permute.xlu2 %746 }
  0x9b   : > { %v745_v52 = vpop.permute.xlu1 %744 }
  0x9d   : > { %v664_v55 = vpop.permute.xlu0 %663 }
  0x9e   : > { %v778_v56 = vsel %vm750_vm2, %v2827_v2, %v664_v55 }
  0x9f   : > { %v3111_v0 = vsel %vm783_vm3, %v778_v56, %v745_v52 }
  0xa0   : > { %2279 = vmatmul.msk.bf16.vlgmr.msra.gmra.mxu3 %vm883_vm4, %v3111_v0  ;;  %v727_v25 = vpop.permute.xlu2 %726 }
  0xa1   : > { %2453 = vmatpush.bf16.msra.mxu3 %v2926_v61  ;;  %v580_v61 = vshll.u32 %v3096_v41, 16 }
  0xa3   : > { %v721_v60 = vpop.permute.xlu1 %720  ;;  %v582_v5 = vrot.slane %v580_v61, 1 }
  0xa4   : > { %v787_v62 = vsel %vm783_vm3, %v754_v57, %v721_v60 }
  0xa5   : > { %v719_v1 = vpop.permute.xlu0 %718  ;;  %2267 = vmatmul.msk.bf16.vlgmr.msra.gmra.mxu0 %vm883_vm4, %v787_v62  ;;  %2454 = vmatpush.bf16.msra.mxu3 %v2941_v8  ;;  %v583_v11 = vor.u32 %v582_v5, %v578_v28 }
  0xa6   : > { %v785_v2 = vsel %vm783_vm3, %v752_v63, %v719_v1 }
  0xa7   : > { %2307 = vmatmul.msk.bf16.vlgmr.msra.gmra.mxu1 %vm883_vm4, %v785_v2  ;;  %v588_v15 = vsel %vm444_vm1, %v583_v11, %v587_v13 }
  0xa8   : > { %659 = vrot.lane.b32.xlu2 %v588_v15, %s2732_s9  ;;  %v837_v40 = vpop.permute.xlu2 %836 }
  0xa9   : > { %2455 = vmatpush.bf16.msra.mxu3 %v2956_v20  ;;  %v844_v46 = vsel %vm750_vm2, %v2921_v59, %v837_v40 }
  0xab   : > { %v725_v3 = vpop.permute.xlu1 %724 }
  0xac   : > { %v791_v8 = vsel %vm783_vm3, %v758_v38, %v725_v3 }
  0xad   : > { %v666_v10 = vpop.permute.xlu0 %665  ;;  %2352 = vmatmul.msk.bf16.gmra.mxu2 %vm883_vm4, %v791_v8  ;;  %2456 = vmatpush.bf16.msra.mxu3 %v2983_v37  ;;  %v1139_v37 = vpack.c.b16 %v1138_v17, %v1138_v17  ;;  %v3242_v17 = vld [vmem:[%s3873_s3] ss:$0 sm:$0xff] }
  0xae   : > { %v780_v54 = vsel %vm750_vm2, %v2855_v44, %v666_v10 }
  0xaf   : > { %v3136_v20 = vsel %vm783_vm3, %v780_v54, %v747_v7  ;;  %v1148_v23 = vshll.u32 %v1139_v37, 16  ;;  %v1155_v51 = vrot.slane %v1139_v37, 1 }
  0xb0   : > { %2280 = vmatmul.msk.bf16.gmra.mxu3 %vm883_vm4, %v3136_v20  ;;  %v650_v50 = vpop.permute.xlu2 %649 }
  0xb1   : > { %2457 = vmatpush.bf16.msra.mxu3 %v3003_v53  ;;  %v1150_v31 = vrot.slane %v1148_v23, 1  ;;  %v764_v59 = vsel %vm750_vm2, %v2963_v26, %v650_v50 }
  0xb3   : > { %v668_v19 = vpop.permute.xlu1 %667  ;;  %v1151_v30 = vsel %vm444_vm1, %v1146_v27, %v1150_v31 }
  0xb4   : > { %1152 = vrot.lane.b32.xlu1 %v1151_v30, %s2732_s9 }
  0xb5   : > { %2268 = vmatmul.msk.bf16.gmra.mxu0 %vm883_vm4, %v3102_v49  ;;  %v646_v44 = vpop.permute.xlu0 %645  ;;  %2458 = vmatpush.bf16.msra.mxu3 %v3049_v43  ;;  %v782_v43 = vsel %vm750_vm2, %v2876_v4, %v668_v19 }
  0xb6   : > { %v760_v53 = vsel %vm750_vm2, %v2883_v12, %v646_v44 }
  0xb7   : > { %2308 = vmatmul.msk.bf16.gmra.mxu1 %vm883_vm4, %v787_v62  ;;  %v793_v33 = vsel %vm783_vm3, %v760_v53, %v727_v25 }
  0xb8   : > { %v743_v58 = vpop.permute.xlu2 %742 }
  0xbb   : > { %v648_v12 = vpop.permute.xlu1 %647 }
  0xbc   : > { %v762_v42 = vsel %vm750_vm2, %v2899_v32, %v648_v12  ;;  %v1154_v32 = vrot.slane %v3145_v29, 1 }
  0xbd   : > { %2353 = vmatmul.msk.bf16.gmra.mxu2 %vm883_vm4, %v793_v33  ;;  %v749_v34 = vpop.permute.xlu0 %748 }
  0xbe   : > { %v3162_v36 = vsel %vm783_vm3, %v782_v43, %v749_v34 }
  0xc0   : > { %2281 = vmatmul.msk.bf16.gmra.mxu3 %vm883_vm4, %v3162_v36  ;;  %v654_v1 = vpop.permute.xlu2 %653 }
  0xc1   : > { %v768_v2 = vsel %vm750_vm2, %v3024_v24, %v654_v1 }
  0xc3   : > { %v842_v39 = vpop.permute.xlu1 %841 }
  0xc4   : > { %v3176_v48 = vsel %vm783_vm3, %v844_v46, %v842_v39 }
  0xc5   : > { %2269 = vmatmul.msk.bf16.gmra.mxu0 %vm883_vm4, %v791_v8  ;;  %v729_v4 = vpop.permute.xlu0 %728 }
  0xc6   : > { %v795_v45 = vsel %vm783_vm3, %v762_v42, %v729_v4 }
  0xc7   : > { %2309 = vmatmul.msk.bf16.gmra.mxu1 %vm883_vm4, %v3102_v49  ;;  %v1156_v49 = vsel %vm669_vm0, %v1154_v32, %v1155_v51 }
  0xc8   : > { %1157 = vrot.lane.b32.xlu2 %v1156_v49, %s2731_s8  ;;  %v737_v28 = vpop.permute.xlu2 %736  ;;  %s2665_s8 = sshra.s32 %s2086_s29, 4  ;;  %s2666_s8 = int_to_ptr.hbm [resolvable:$true] %s2665_s8 }
  0xc9   : > { %s2667_s9 = scalar_lea.hbm %s2666_s8, 256  ;;  %p2672_p1 = scmp.lt.s32.totalorder %s2666_s8, %s3874_s4 }
  0xca   : > { %p2668_p12 = scmp.ne.s32.totalorder %s2666_s8, %s2667_s9  ;;  %p2673_p2 = scmp.lt.s32.totalorder %s2671_s11, %s2667_s9 }
  0xcb   : > { %v731_v52 = vpop.permute.xlu1 %730 }
  0xcc   : > { %v797_v57 = vsel %vm783_vm3, %v764_v59, %v731_v52  ;;  %p2669_p13 = pnand %p2668_p12, %p2800_p4  ;;  %p2674_p3 = por %p2673_p2, %p2672_p1 }
  0xcd   : > { %2354 = vmatmul.msk.bf16.gmra.mxu2 %vm883_vm4, %v795_v45  ;;  %v662_v55 = vpop.permute.xlu0 %661 }
  0xce   : > { %v776_v56 = vsel %vm750_vm2, %v2947_v14, %v662_v55  ;;  %p2670_p0 = pneg %p2669_p13 }
  0xcf   : > { %v3192_v60 = vsel %vm783_vm3, %v776_v56, %v743_v58 }
  0xd0   : > { %2282 = vmatmul.msk.bf16.gmra.mxu3 %vm883_vm4, %v3176_v48  ;;  %p2675_p5 = pnand %p2674_p3, %p2670_p0 }
  0xd3   : > { %v733_v14 = vpop.permute.xlu1 %732 }
  0xd5   : > { %2270 = vmatmul.msk.bf16.gmra.mxu0 %vm883_vm4, %v793_v33  ;;  %v652_v62 = vpop.permute.xlu0 %651 }
  0xd6   : > { %v766_v26 = vsel %vm750_vm2, %v2994_v47, %v652_v62 }
  0xd7   : > { %2310 = vmatmul.msk.bf16.gmra.mxu1 %vm883_vm4, %v791_v8  ;;  %v799_v63 = vsel %vm783_vm3, %v766_v26, %v733_v14 }
  0xdb   : > { %v656_v47 = vpop.permute.xlu1 %655 }
  0xdc   : > { %v770_v3 = vsel %vm750_vm2, %v3035_v35, %v656_v47 }
  0xdd   : > { %2355 = vmatmul.msk.bf16.gmra.mxu2 %vm883_vm4, %v797_v57  ;;  %v735_v38 = vpop.permute.xlu0 %734  ;;  %v803_v5 = vsel %vm783_vm3, %v770_v3, %v737_v28 }
  0xde   : > { %v801_v61 = vsel %vm783_vm3, %v768_v2, %v735_v38 }
  0xe0   : > { %2319 = vmatmul.msk.bf16.vlgmr.msrb.gmra.mxu3 %vm883_vm4, %v3192_v60 }
  0xe3   : > { %v739_v8 = vpop.permute.xlu1 %738 }
  0xe5   : > { %2271 = vmatmul.msk.bf16.gmra.mxu0 %vm883_vm4, %v795_v45  ;;  %v658_v24 = vpop.permute.xlu0 %657 }
  0xe6   : > { %v772_v6 = vsel %vm750_vm2, %v3077_v9, %v658_v24  ;;  %v3236_v9 = vld [vmem:[%s3872_s2] ss:$0 sm:$0xff] }
  0xe7   : > { %2311 = vmatmul.msk.bf16.gmra.mxu1 %vm883_vm4, %v793_v33  ;;  %v3225_v7 = vsel %vm783_vm3, %v772_v6, %v739_v8 }
  0xed   : > { %2356 = vmatmul.msk.bf16.gmra.mxu2 %vm883_vm4, %v799_v63  ;;  %v741_v37 = vpop.permute.xlu0 %740 }
  0xf0   : > { %2320 = vmatmul.msk.bf16.gmra.mxu3 %vm883_vm4, %v3111_v0 }
  0xf5   : > { %2272 = vmatmul.msk.bf16.gmra.mxu0 %vm883_vm4, %v797_v57 }
  0xf7   : > { %2312 = vmatmul.msk.bf16.gmra.mxu1 %vm883_vm4, %v795_v45 }
  0xfd   : > { %2357 = vmatmul.msk.bf16.gmra.mxu2 %vm883_vm4, %v801_v61 }
 0x100   : > { %2321 = vmatmul.msk.bf16.gmra.mxu3 %vm883_vm4, %v3136_v20 }
 0x102   : > { %v660_v54 = vpop.permute.xlu2 %659 }
 0x105   : > { %2273 = vmatmul.msk.bf16.gmra.mxu0 %vm883_vm4, %v799_v63 }
 0x107   : > { %2313 = vmatmul.msk.bf16.gmra.mxu1 %vm883_vm4, %v797_v57 }
 0x10d   : > { %2358 = vmatmul.msk.bf16.gmra.mxu2 %vm883_vm4, %v803_v5 }
 0x110   : > { %2322 = vmatmul.msk.bf16.gmra.mxu3 %vm883_vm4, %v3162_v36 }
 0x115   : > { %2274 = vmatmul.msk.bf16.gmra.mxu0 %vm883_vm4, %v801_v61 }
 0x117   : > { %2314 = vmatmul.msk.bf16.gmra.mxu1 %vm883_vm4, %v799_v63 }
 0x11b   : > { %v1210_v35 = vpop.f32.mrf.mxu2 }
 0x11d   : > { %2359 = vmatmul.msk.bf16.gmra.mxu2 %vm883_vm4, %v3225_v7 }
 0x120   : > { %2363 = vmatmul.msk.bf16.vlgmr.msra.gmra.mxu3 %vm883_vm4, %v3136_v20  ;;  %v774_v20 = vsel %vm750_vm2, %v3096_v41, %v660_v54 }
 0x121   : > { %v3249_v21 = vsel %vm783_vm3, %v774_v20, %v741_v37 }
 0x122   : > { %v925_v10 = vpop.f32.mrf.mxu0 }
 0x123   : > { %v3231_v11 = vpop.f32.mrf.mxu3  ;;  %v1212_v18 = vpop.f32.mrf.mxu2 }
 0x124   : > { %v1052_v13 = vpop.f32.mrf.mxu1 }
 0x125   : > { %v1053_v15 = vadd.f32 %v1052_v13, %v925_v10  ;;  %2275 = vmatmul.msk.bf16.gmra.mxu0 %vm883_vm4, %v803_v5 }
 0x127   : > { %v1290_v16 = vadd.f32 %v1210_v35, %v1053_v15  ;;  %2315 = vmatmul.msk.bf16.gmra.mxu1 %vm883_vm4, %v801_v61  ;;  %v1153_v15 = vpop.permute.xlu1 %1152 }
 0x129   : > { %v1326_v44 = vmul.f32 %v3236_v9, %v1290_v16 }
 0x12a   : > { %v927_v19 = vpop.f32.mrf.mxu0 }
 0x12b   : > { %v3252_v22 = vadd.f32 %v3242_v17, %v1326_v44  ;;  %v3254_v23 = vpop.f32.mrf.mxu3 }
 0x12c   : > { %v1054_v53 = vpop.f32.mrf.mxu1 }
 0x12d   : > { %v2367_v25 = vmul.f32 -1.442695, %v3252_v22  ;;  %v1055_v27 = vadd.f32 %v1054_v53, %v927_v19  ;;  %2360 = vmatmul.msk.bf16.gmra.mxu2 %vm883_vm4, %v3249_v21 }
 0x12f   : > { %2521 = vpow2.f32 %v2367_v25  ;;  %v1291_v41 = vadd.f32 %v1212_v18, %v1055_v27  ;;  %v1160_v25 = vsel %vm750_vm2, %v3145_v29, %v1153_v15  ;;  %v1158_v27 = vpop.permute.xlu2 %1157 }
 0x130   : > { %v1215_v31 = vpop.f32.mrf.mxu2  ;;  %2364 = vmatmul.msk.bf16.gmra.mxu3 %vm883_vm4, %v3162_v36 }
 0x131   : > { %v1327_v33 = vmul.f32 %v3236_v9, %v1291_v41 }
 0x132   : > { %v930_v30 = vpop.f32.mrf.mxu0 }
 0x133   : > { %v3263_v43 = vadd.f32 %v3242_v17, %v1327_v33  ;;  %v3265_v34 = vpop.f32.mrf.mxu3 }
 0x134   : > { %v1057_v12 = vpop.f32.mrf.mxu1 }
 0x135   : > { %v2522_v40 = vpop.eup %2521  ;;  %v2368_v42 = vmul.f32 -1.442695, %v3263_v43  ;;  %v1058_v4 = vadd.f32 %v1057_v12, %v930_v30  ;;  %2276 = vmatmul.msk.bf16.gmra.mxu0 %vm883_vm4, %v3225_v7 }
 0x136   : > { %v1490_v45 = vadd.f32 1.0, %v2522_v40  ;;  %v1162_v40 = vsel %vm783_vm3, %v1160_v25, %v1158_v27 }
 0x137   : > { %2523 = vpow2.f32 %v2368_v42  ;;  %v1292_v46 = vadd.f32 %v1215_v31, %v1058_v4  ;;  %2316 = vmatmul.msk.bf16.gmra.mxu1 %vm883_vm4, %v803_v5 }
 0x138   : > { %2525 = vrcp.f32 %v1490_v45  ;;  %v1217_v36 = vpop.f32.mrf.mxu2  ;;  %v1533_v1 = vand.u32 2147483648, %v1490_v45  ;;  %v1531_v61 = vand.u32 2147483647, %v1490_v45  ;;  %vm1527_vm6 = vweird.f32 %v1490_v45 }
 0x139   : > { %v1328_v39 = vmul.f32 %v3236_v9, %v1292_v46 }
 0x13a   : > { %v932_v50 = vpop.f32.mrf.mxu0  ;;  %v1534_v35 = vor.u32 1.1754944e-38, %v1533_v1  ;;  %vm1532_vm8 = vcmp.eq.f32.partialorder %v1531_v61, 8.507059e+37 }
 0x13b   : > { %v3273_v32 = vadd.f32 %v3242_v17, %v1328_v39  ;;  %v3275_v51 = vpop.f32.mrf.mxu3 }
 0x13c   : > { %v1059_v49 = vpop.f32.mrf.mxu1 }
 0x13d   : > { %v2524_v59 = vpop.eup %2523  ;;  %v2369_v52 = vmul.f32 -1.442695, %v3273_v32  ;;  %v1060_v55 = vadd.f32 %v1059_v49, %v932_v50  ;;  %2361 = vmatmul.msk.bf16.gmra.mxu2 %vm883_vm4, %v3192_v60 }
 0x13e   : > { %v2526_v56 = vpop.eup %2525  ;;  %v3280_v57 = vadd.f32 1.0, %v2524_v59 }
 0x13f   : > { %v1523_v58 = vmul.f32 %v2526_v56, %v1490_v45  ;;  %2527 = vpow2.f32 %v2369_v52  ;;  %v1293_v62 = vadd.f32 %v1217_v36, %v1060_v55  ;;  %vm1528_vm5 = vweird.f32 %v2526_v56 }
 0x140   : > { %2529 = vrcp.f32 %v3280_v57  ;;  %v1220_v26 = vpop.f32.mrf.mxu2  ;;  %2365 = vmatmul.msk.bf16.gmra.mxu3 %vm883_vm4, %v3176_v48  ;;  %vm1529_vm7 = vmor %vm1527_vm6, %vm1528_vm5  ;;  %v1548_v19 = vand.u32 2147483648, %v3280_v57  ;;  %v1546_v41 = vand.u32 2147483647, %v3280_v57  ;;  %vm1542_vm11 = vweird.f32 %v3280_v57 }
 0x141   : > { %v1524_v14 = vsub.f32 1.0, %v1523_v58  ;;  %v1329_v63 = vmul.f32 %v3236_v9, %v1293_v62 }
 0x142   : > { %v935_v2 = vpop.f32.mrf.mxu0  ;;  %v1549_v4 = vor.u32 1.1754944e-38, %v1548_v19  ;;  %vm1547_vm13 = vcmp.eq.f32.partialorder %v1546_v41, 8.507059e+37 }
 0x143   : > { %v1525_v38 = vmul.f32 %v2526_v56, %v1524_v14  ;;  %v3288_v47 = vadd.f32 %v3242_v17, %v1329_v63  ;;  %v3290_v3 = vpop.f32.mrf.mxu3 }
 0x144   : > { %v1062_v28 = vpop.f32.mrf.mxu1 }
 0x145   : > { %v2528_v5 = vpop.eup %2527  ;;  %v1526_v24 = vadd.f32 %v2526_v56, %v1525_v38  ;;  %v2370_v48 = vmul.f32 -1.442695, %v3288_v47  ;;  %v1063_v6 = vadd.f32 %v1062_v28, %v935_v2  ;;  %2277 = vmatmul.msk.bf16.gmra.mxu0 %vm883_vm4, %v3249_v21 }
 0x146   : > { %v2530_v8 = vpop.eup %2529  ;;  %v3297_v10 = vadd.f32 1.0, %v2528_v5 }
 0x147   : > { %v1530_v13 = vsel %vm1529_vm7, %v2526_v56, %v1526_v24  ;;  %v1538_v54 = vmul.f32 %v2530_v8, %v3280_v57  ;;  %2531 = vpow2.f32 %v2370_v48  ;;  %2317 = vmatmul.msk.bf16.gmra.mxu1 %vm883_vm4, %v3225_v7  ;;  %v1294_v44 = vadd.f32 %v1220_v26, %v1063_v6 }
 0x148   : > { %v1535_v16 = vsel %vm1532_vm8, %v1534_v35, %v1530_v13  ;;  %2533 = vrcp.f32 %v3297_v10  ;;  %v1222_v20 = vpop.f32.mrf.mxu2  ;;  %vm1543_vm10 = vweird.f32 %v2530_v8  ;;  %v1563_v55 = vand.u32 2147483648, %v3297_v10 }
 0x149   : > { %v2002_v37 = vmul.f32 %v1535_v16, %v3252_v22  ;;  %v1539_v18 = vsub.f32 1.0, %v1538_v54  ;;  %v1330_v22 = vmul.f32 %v3236_v9, %v1294_v44  ;;  %vm1544_vm12 = vmor %vm1542_vm11, %vm1543_vm10  ;;  %v1561_v62 = vand.u32 2147483647, %v3297_v10 }
 0x14a   : > { %v937_v53 = vpop.f32.mrf.mxu0  ;;  %vm1557_vm15 = vweird.f32 %v3297_v10  ;;  %v1564_v38 = vor.u32 1.1754944e-38, %v1563_v55 }
 0x14b   : > { %2035 = vst.msk [vmem:[%s3307_s10] sm:$0xff] %vm2034_vm9, %v2002_v37  ;;  %v1540_v7 = vmul.f32 %v2530_v8, %v1539_v18  ;;  %v3313_v31 = vpop.f32.mrf.mxu3  ;;  %v3317_v29 = vadd.f32 %v3242_v17, %v1330_v22  ;;  %vm1562_vm1 = vcmp.eq.f32.partialorder %v1561_v62, 8.507059e+37 }
 0x14c   : > { %v1064_v33 = vpop.f32.mrf.mxu1 }
 0x14d   : > { %v2532_v30 = vpop.eup %2531  ;;  %v1541_v12 = vadd.f32 %v2530_v8, %v1540_v7  ;;  %2362 = vmatmul.msk.bf16.gmra.mxu2 %vm883_vm4, %v3111_v0  ;;  %v1065_v46 = vadd.f32 %v1064_v33, %v937_v53  ;;  %v2371_v50 = vmul.f32 -1.442695, %v3317_v29 }
 0x14e   : > { %v2534_v42 = vpop.eup %2533  ;;  %v3322_v45 = vadd.f32 1.0, %v2532_v30 }
 0x14f   : > { %v1545_v36 = vsel %vm1544_vm12, %v2530_v8, %v1541_v12  ;;  %v1553_v39 = vmul.f32 %v2534_v42, %v3297_v10  ;;  %v1295_v56 = vadd.f32 %v1222_v20, %v1065_v46  ;;  %vm1558_vm14 = vweird.f32 %v2534_v42 }
 0x150   : > { %v1550_v49 = vsel %vm1547_vm13, %v1549_v4, %v1545_v36  ;;  %2535 = vrcp.f32 %v3322_v45  ;;  %v1225_v59 = vpop.f32.mrf.mxu2  ;;  %2366 = vmatmul.msk.bf16.gmra.mxu3 %vm883_vm4, %v1162_v40  ;;  %vm1559_vm0 = vmor %vm1557_vm15, %vm1558_vm14  ;;  %v1576_v15 = vand.u32 2147483647, %v3322_v45  ;;  %v1578_v16 = vand.u32 2147483648, %v3322_v45 }
 0x151   : > { %v2003_v0 = vmul.f32 %v1550_v49, %v3263_v43  ;;  %v1554_v52 = vsub.f32 1.0, %v1553_v39  ;;  %2537 = vpow2.f32 %v2371_v50  ;;  %v1331_v14 = vmul.f32 %v3236_v9, %v1295_v56 }
 0x152   : > { %v940_v57 = vpop.f32.mrf.mxu0  ;;  %vm1572_vm3 = vweird.f32 %v3322_v45  ;;  %v1579_v25 = vor.u32 1.1754944e-38, %v1578_v16  ;;  %vm1577_vm5 = vcmp.eq.f32.partialorder %v1576_v15, 8.507059e+37 }
 0x153   : > { %2036 = vst.msk [vmem:[%s3307_s10 + $0x8] sm:$0xff] %vm2034_vm9, %v2003_v0  ;;  %v1555_v58 = vmul.f32 %v2534_v42, %v1554_v52  ;;  %v3333_v26 = vpop.f32.mrf.mxu3  ;;  %v3340_v61 = vadd.f32 %v3242_v17, %v1331_v14 }
 0x154   : > { %v1067_v63 = vpop.f32.mrf.mxu1 }
 0x155   : > { %v1556_v1 = vadd.f32 %v2534_v42, %v1555_v58  ;;  %v1068_v43 = vadd.f32 %v1067_v63, %v940_v57  ;;  %2278 = vmatmul.msk.bf16.gmra.mxu0 %vm883_vm4, %v3192_v60  ;;  %v2372_v60 = vmul.f32 -1.442695, %v3340_v61 }
 0x156   : > { %v2536_v2 = vpop.eup %2535 }
 0x157   : > { %v2538_v28 = vpop.eup %2537  ;;  %v1560_v5 = vsel %vm1559_vm0, %v2534_v42, %v1556_v1  ;;  %v1568_v24 = vmul.f32 %v2536_v2, %v3322_v45  ;;  %v1296_v48 = vadd.f32 %v1225_v59, %v1068_v43  ;;  %2318 = vmatmul.msk.bf16.gmra.mxu1 %vm883_vm4, %v3249_v21  ;;  %vm1573_vm2 = vweird.f32 %v2536_v2 }
 0x158   : > { %v1565_v6 = vsel %vm1562_vm1, %v1564_v38, %v1560_v5  ;;  %v1494_v8 = vadd.f32 1.0, %v2538_v28  ;;  %v1227_v35 = vpop.f32.mrf.mxu2  ;;  %vm1574_vm4 = vmor %vm1572_vm3, %vm1573_vm2 }
 0x159   : > { %v2004_v10 = vmul.f32 %v1565_v6, %v3273_v32  ;;  %v1569_v13 = vsub.f32 1.0, %v1568_v24  ;;  %v1332_v54 = vmul.f32 %v3236_v9, %v1296_v48 }
 0x15a   : > { %2539 = vrcp.f32 %v1494_v8  ;;  %v942_v20 = vpop.f32.mrf.mxu0  ;;  %v1591_v50 = vand.u32 2147483647, %v1494_v8  ;;  %v1593_v49 = vand.u32 2147483648, %v1494_v8  ;;  %vm1587_vm7 = vweird.f32 %v1494_v8 }
 0x15b   : > { %2037 = vst.msk [vmem:[%s3307_s10 + $0x10] sm:$0xff] %vm2034_vm9, %v2004_v10  ;;  %v1570_v37 = vmul.f32 %v2536_v2, %v1569_v13  ;;  %2541 = vpow2.f32 %v2372_v60  ;;  %v3353_v21 = vadd.f32 %v3242_v17, %v1332_v54  ;;  %v3355_v18 = vpop.f32.mrf.mxu3 }
 0x15c   : > { %v1069_v32 = vpop.f32.mrf.mxu1  ;;  %v1594_v62 = vor.u32 1.1754944e-38, %v1593_v49  ;;  %vm1592_vm10 = vcmp.eq.f32.partialorder %v1591_v50, 8.507059e+37 }
 0x15d   : > { %v1571_v44 = vadd.f32 %v2536_v2, %v1570_v37  ;;  %v2373_v19 = vmul.f32 -1.442695, %v3353_v21  ;;  %v1070_v53 = vadd.f32 %v1069_v32, %v942_v20 }
 0x15f   : > { %v1575_v27 = vsel %vm1574_vm4, %v2536_v2, %v1571_v44  ;;  %2543 = vpow2.f32 %v2373_v19  ;;  %v1297_v7 = vadd.f32 %v1227_v35, %v1070_v53 }
 0x160   : > { %v2540_v41 = vpop.eup %2539  ;;  %v1580_v22 = vsel %vm1577_vm5, %v1579_v25, %v1575_v27  ;;  %v1230_v33 = vpop.f32.mrf.mxu2 }
 0x161   : > { %v2542_v30 = vpop.eup %2541  ;;  %v2005_v12 = vmul.f32 %v1580_v22, %v3288_v47  ;;  %v1583_v40 = vmul.f32 %v2540_v41, %v1494_v8  ;;  %v1333_v42 = vmul.f32 %v3236_v9, %v1297_v7  ;;  %vm1588_vm6 = vweird.f32 %v2540_v41 }
 0x162   : > { %v1495_v4 = vadd.f32 1.0, %v2542_v30  ;;  %v945_v45 = vpop.f32.mrf.mxu0  ;;  %vm1589_vm8 = vmor %vm1587_vm7, %vm1588_vm6 }
 0x163   : > { %2038 = vst.msk [vmem:[%s3307_s10 + $0x18] sm:$0xff] %vm2034_vm9, %v2005_v12  ;;  %v1584_v46 = vsub.f32 1.0, %v1583_v40  ;;  %v3364_v36 = vadd.f32 %v3242_v17, %v1333_v42  ;;  %v3366_v39 = vpop.f32.mrf.mxu3 }
 0x164   : > { %2545 = vrcp.f32 %v1495_v4  ;;  %v1072_v59 = vpop.f32.mrf.mxu1  ;;  %v1606_v54 = vand.u32 2147483647, %v1495_v4  ;;  %v1608_v15 = vand.u32 2147483648, %v1495_v4  ;;  %vm1602_vm12 = vweird.f32 %v1495_v4 }
 0x165   : > { %v2544_v0 = vpop.eup %2543  ;;  %v1585_v52 = vmul.f32 %v2540_v41, %v1584_v46  ;;  %v2374_v47 = vmul.f32 -1.442695, %v3364_v36  ;;  %v1073_v55 = vadd.f32 %v1072_v59, %v945_v45 }
 0x166   : > { %v3369_v56 = vadd.f32 1.0, %v2544_v0  ;;  %vm1607_vm14 = vcmp.eq.f32.partialorder %v1606_v54, 8.507059e+37  ;;  %v1609_v53 = vor.u32 1.1754944e-38, %v1608_v15 }
 0x167   : > { %v1586_v57 = vadd.f32 %v2540_v41, %v1585_v52  ;;  %2547 = vpow2.f32 %v2374_v47  ;;  %v1298_v58 = vadd.f32 %v1230_v33, %v1073_v55 }
 0x168   : > { %2549 = vrcp.f32 %v3369_v56  ;;  %v1232_v14 = vpop.f32.mrf.mxu2  ;;  %v1621_v25 = vand.u32 2147483647, %v3369_v56  ;;  %v1623_v27 = vand.u32 2147483648, %v3369_v56  ;;  %vm1617_vm0 = vweird.f32 %v3369_v56 }
 0x169   : > { %v1590_v63 = vsel %vm1589_vm8, %v2540_v41, %v1586_v57  ;;  %v1334_v1 = vmul.f32 %v3236_v9, %v1298_v58 }
 0x16a   : > { %v2546_v43 = vpop.eup %2545  ;;  %v1595_v2 = vsel %vm1592_vm10, %v1594_v62, %v1590_v63  ;;  %v947_v38 = vpop.f32.mrf.mxu0  ;;  %v1624_v59 = vor.u32 1.1754944e-38, %v1623_v27  ;;  %vm1622_vm2 = vcmp.eq.f32.partialorder %v1621_v25, 8.507059e+37 }
 0x16b   : > { %v2006_v28 = vmul.f32 %v1595_v2, %v3317_v29  ;;  %v1598_v5 = vmul.f32 %v2546_v43, %v1495_v4  ;;  %v3375_v24 = vadd.f32 %v3242_v17, %v1334_v1  ;;  %v3377_v48 = vpop.f32.mrf.mxu3  ;;  %vm1603_vm11 = vweird.f32 %v2546_v43 }
 0x16c   : > { %v1074_v6 = vpop.f32.mrf.mxu1  ;;  %vm1604_vm13 = vmor %vm1602_vm12, %vm1603_vm11 }
 0x16d   : > { %v2548_v8 = vpop.eup %2547  ;;  %2039 = vst.msk [vmem:[%s3307_s10 + $0x20] sm:$0xff] %vm2034_vm9, %v2006_v28  ;;  %v1599_v60 = vsub.f32 1.0, %v1598_v5  ;;  %v2375_v35 = vmul.f32 -1.442695, %v3375_v24  ;;  %v1075_v10 = vadd.f32 %v1074_v6, %v947_v38 }
 0x16e   : > { %v2550_v13 = vpop.eup %2549  ;;  %v3382_v16 = vadd.f32 1.0, %v2548_v8 }
 0x16f   : > { %v1600_v29 = vmul.f32 %v2546_v43, %v1599_v60  ;;  %v1613_v20 = vmul.f32 %v2550_v13, %v3369_v56  ;;  %2551 = vpow2.f32 %v2375_v35  ;;  %v1299_v19 = vadd.f32 %v1232_v14, %v1075_v10 }
 0x170   : > { %2553 = vrcp.f32 %v3382_v16  ;;  %v1235_v37 = vpop.f32.mrf.mxu2  ;;  %vm1618_vm15 = vweird.f32 %v2550_v13  ;;  %v1638_v62 = vand.u32 2147483648, %v3382_v16  ;;  %vm1632_vm4 = vweird.f32 %v3382_v16 }
 0x171   : > { %v1601_v32 = vadd.f32 %v2546_v43, %v1600_v29  ;;  %v1614_v44 = vsub.f32 1.0, %v1613_v20  ;;  %v1335_v33 = vmul.f32 %v3236_v9, %v1299_v19  ;;  %vm1619_vm1 = vmor %vm1617_vm0, %vm1618_vm15 }
 0x172   : > { %v950_v7 = vpop.f32.mrf.mxu0  ;;  %v1639_v60 = vor.u32 1.1754944e-38, %v1638_v62 }
 0x173   : > { %v1605_v41 = vsel %vm1604_vm13, %v2546_v43, %v1601_v32  ;;  %v1615_v22 = vmul.f32 %v2550_v13, %v1614_v44  ;;  %v1117_v30 = vpop.f32.mrf.mxu3  ;;  %v3395_v50 = vadd.f32 %v3242_v17, %v1335_v33  ;;  %v1636_v43 = vand.u32 2147483647, %v3382_v16 }
 0x174   : > { %v1610_v12 = vsel %vm1607_vm14, %v1609_v53, %v1605_v41  ;;  %v3390_v40 = vadd.f32 %v1117_v30, %v3265_v34  ;;  %v1077_v42 = vpop.f32.mrf.mxu1 }
 0x175   : > { %v2552_v4 = vpop.eup %2551  ;;  %v2007_v45 = vmul.f32 %v1610_v12, %v3340_v61  ;;  %v1616_v46 = vadd.f32 %v2550_v13, %v1615_v22  ;;  %v1078_v52 = vadd.f32 %v1077_v42, %v950_v7  ;;  %v2376_v61 = vmul.f32 -1.442695, %v3395_v50 }
 0x176   : > { %v2554_v49 = vpop.eup %2553  ;;  %v3397_v0 = vadd.f32 1.0, %v2552_v4  ;;  %vm1637_vm6 = vcmp.eq.f32.partialorder %v1636_v43, 8.507059e+37 }
 0x177   : > { %2040 = vst.msk [vmem:[%s3307_s10 + $0x28] sm:$0xff] %vm2034_vm9, %v2007_v45  ;;  %v1620_v34 = vsel %vm1619_vm1, %v2550_v13, %v1616_v46  ;;  %v1628_v47 = vmul.f32 %v2554_v49, %v3382_v16  ;;  %v1300_v14 = vadd.f32 %v1235_v37, %v1078_v52  ;;  %vm1633_vm3 = vweird.f32 %v2554_v49 }
 0x178   : > { %v1625_v55 = vsel %vm1622_vm2, %v1624_v59, %v1620_v34  ;;  %2555 = vrcp.f32 %v3397_v0  ;;  %v1237_v56 = vpop.f32.mrf.mxu2  ;;  %vm1634_vm5 = vmor %vm1632_vm4, %vm1633_vm3  ;;  %v1651_v19 = vand.u32 2147483647, %v3397_v0  ;;  %v1653_v53 = vand.u32 2147483648, %v3397_v0 }
 0x179   : > { %v2008_v57 = vmul.f32 %v1625_v55, %v3353_v21  ;;  %v1629_v58 = vsub.f32 1.0, %v1628_v47  ;;  %2557 = vpow2.f32 %v2376_v61  ;;  %v1336_v38 = vmul.f32 %v3236_v9, %v1300_v14 }
 0x17a   : > { %v952_v63 = vpop.f32.mrf.mxu0  ;;  %vm1647_vm8 = vweird.f32 %v3397_v0  ;;  %v1654_v42 = vor.u32 1.1754944e-38, %v1653_v53  ;;  %vm1652_vm11 = vcmp.eq.f32.partialorder %v1651_v19, 8.507059e+37 }
 0x17b   : > { %2041 = vst.msk [vmem:[%s3307_s10 + $0x30] sm:$0xff] %vm2034_vm9, %v2008_v57  ;;  %v1630_v1 = vmul.f32 %v2554_v49, %v1629_v58  ;;  %v1119_v2 = vpop.f32.mrf.mxu3  ;;  %v3415_v35 = vadd.f32 %v3242_v17, %v1336_v38 }
 0x17c   : > { %v3411_v28 = vadd.f32 %v1119_v2, %v3275_v51  ;;  %v1079_v5 = vpop.f32.mrf.mxu1 }
 0x17d   : > { %v1631_v21 = vadd.f32 %v2554_v49, %v1630_v1  ;;  %v1080_v6 = vadd.f32 %v1079_v5, %v952_v63  ;;  %v2377_v20 = vmul.f32 -1.442695, %v3415_v35 }
 0x17e   : > { %v2556_v8 = vpop.eup %2555 }
 0x17f   : > { %v2558_v10 = vpop.eup %2557  ;;  %v1635_v13 = vsel %vm1634_vm5, %v2554_v49, %v1631_v21  ;;  %v1643_v54 = vmul.f32 %v2556_v8, %v3397_v0  ;;  %v1301_v15 = vadd.f32 %v1237_v56, %v1080_v6  ;;  %vm1648_vm7 = vweird.f32 %v2556_v8 }
 0x180   : > { %v1640_v51 = vsel %vm1637_vm6, %v1639_v60, %v1635_v13  ;;  %v1499_v29 = vadd.f32 1.0, %v2558_v10  ;;  %v1240_v37 = vpop.f32.mrf.mxu2  ;;  %vm1649_vm10 = vmor %vm1647_vm8, %vm1648_vm7 }
 0x181   : > { %v2009_v16 = vmul.f32 %v1640_v51, %v3364_v36  ;;  %v1644_v32 = vsub.f32 1.0, %v1643_v54  ;;  %v1337_v44 = vmul.f32 %v3236_v9, %v1301_v15 }
 0x182   : > { %2559 = vrcp.f32 %v1499_v29  ;;  %v955_v25 = vpop.f32.mrf.mxu0  ;;  %v1666_v58 = vand.u32 2147483647, %v1499_v29  ;;  %v1668_v62 = vand.u32 2147483648, %v1499_v29  ;;  %vm1662_vm13 = vweird.f32 %v1499_v29 }
 0x183   : > { %2042 = vst.msk [vmem:[%s3307_s10 + $0x38] sm:$0xff] %vm2034_vm9, %v2009_v16  ;;  %v1645_v27 = vmul.f32 %v2556_v8, %v1644_v32  ;;  %2561 = vpow2.f32 %v2377_v20  ;;  %v3426_v7 = vadd.f32 %v3242_v17, %v1337_v44  ;;  %v1122_v41 = vpop.f32.mrf.mxu3 }
 0x184   : > { %v3429_v36 = vadd.f32 %v1122_v41, %v3290_v3  ;;  %v1082_v22 = vpop.f32.mrf.mxu1  ;;  %v1669_v6 = vor.u32 1.1754944e-38, %v1668_v62  ;;  %vm1667_vm15 = vcmp.eq.f32.partialorder %v1666_v58, 8.507059e+37 }
 0x185   : > { %v1646_v33 = vadd.f32 %v2556_v8, %v1645_v27  ;;  %v2378_v30 = vmul.f32 -1.442695, %v3426_v7  ;;  %v1083_v12 = vadd.f32 %v1082_v22, %v955_v25 }
 0x187   : > { %v1650_v4 = vsel %vm1649_vm10, %v2556_v8, %v1646_v33  ;;  %2563 = vpow2.f32 %v2378_v30  ;;  %v1302_v45 = vadd.f32 %v1240_v37, %v1083_v12 }
 0x188   : > { %v2560_v46 = vpop.eup %2559  ;;  %v1655_v49 = vsel %vm1652_vm11, %v1654_v42, %v1650_v4  ;;  %v1242_v59 = vpop.f32.mrf.mxu2 }
 0x189   : > { %v2562_v52 = vpop.eup %2561  ;;  %v2010_v3 = vmul.f32 %v1655_v49, %v3375_v24  ;;  %v1658_v34 = vmul.f32 %v2560_v46, %v1499_v29  ;;  %v1338_v47 = vmul.f32 %v3236_v9, %v1302_v45  ;;  %vm1663_vm12 = vweird.f32 %v2560_v46 }
 0x18a   : > { %v1500_v0 = vadd.f32 1.0, %v2562_v52  ;;  %v957_v61 = vpop.f32.mrf.mxu0  ;;  %vm1664_vm14 = vmor %vm1662_vm13, %vm1663_vm12 }
 0x18b   : > { %2043 = vst.msk [vmem:[%s3307_s10 + $0x40] sm:$0xff] %vm2034_vm9, %v2010_v3  ;;  %v1659_v55 = vsub.f32 1.0, %v1658_v34  ;;  %v3438_v56 = vadd.f32 %v3242_v17, %v1338_v47  ;;  %v1124_v57 = vpop.f32.mrf.mxu3 }
 0x18c   : > { %2565 = vrcp.f32 %v1500_v0  ;;  %v1084_v14 = vpop.f32.mrf.mxu1  ;;  %v3442_v43 = vadd.f32 %v1124_v57, %v3313_v31  ;;  %v1681_v27 = vand.u32 2147483647, %v1500_v0  ;;  %v1683_v41 = vand.u32 2147483648, %v1500_v0 }
 0x18d   : > { %v2564_v63 = vpop.eup %2563  ;;  %v1660_v1 = vmul.f32 %v2560_v46, %v1659_v55  ;;  %v2379_v24 = vmul.f32 -1.442695, %v3438_v56  ;;  %v1085_v2 = vadd.f32 %v1084_v14, %v957_v61  ;;  %vm1677_vm1 = vweird.f32 %v1500_v0 }
 0x18e   : > { %v3444_v38 = vadd.f32 1.0, %v2564_v63  ;;  %vm1682_vm3 = vcmp.eq.f32.partialorder %v1681_v27, 8.507059e+37  ;;  %v1684_v42 = vor.u32 1.1754944e-38, %v1683_v41 }
 0x18f   : > { %v1661_v5 = vadd.f32 %v2560_v46, %v1660_v1  ;;  %2567 = vpow2.f32 %v2379_v24  ;;  %v1303_v21 = vadd.f32 %v1242_v59, %v1085_v2 }
 0x190   : > { %2569 = vrcp.f32 %v3444_v38  ;;  %v1245_v8 = vpop.f32.mrf.mxu2  ;;  %v1696_v4 = vand.u32 2147483647, %v3444_v38  ;;  %v1698_v45 = vand.u32 2147483648, %v3444_v38  ;;  %vm1692_vm5 = vweird.f32 %v3444_v38 }
 0x191   : > { %v1665_v60 = vsel %vm1664_vm14, %v2560_v46, %v1661_v5  ;;  %v1339_v10 = vmul.f32 %v3236_v9, %v1303_v21 }
 0x192   : > { %v2566_v31 = vpop.eup %2565  ;;  %v1670_v13 = vsel %vm1667_vm15, %v1669_v6, %v1665_v60  ;;  %v960_v54 = vpop.f32.mrf.mxu0  ;;  %v1699_v63 = vor.u32 1.1754944e-38, %v1698_v45  ;;  %vm1697_vm7 = vcmp.eq.f32.partialorder %v1696_v4, 8.507059e+37  ;;  %v1113_v6 = vadd.f32 %v3366_v39, %v3231_v11 }
 0x193   : > { %v2011_v15 = vmul.f32 %v1670_v13, %v3395_v50  ;;  %v1673_v51 = vmul.f32 %v2566_v31, %v1500_v0  ;;  %v3451_v29 = vadd.f32 %v3242_v17, %v1339_v10  ;;  %v1127_v20 = vpop.f32.mrf.mxu3  ;;  %vm1678_vm0 = vweird.f32 %v2566_v31 }
 0x194   : > { %v3454_v37 = vadd.f32 %v1127_v20, %v3333_v26  ;;  %v1087_v16 = vpop.f32.mrf.mxu1  ;;  %vm1679_vm2 = vmor %vm1677_vm1, %vm1678_vm0 }
 0x195   : > { %v2568_v32 = vpop.eup %2567  ;;  %2044 = vst.msk [vmem:[%s3307_s10 + $0x48] sm:$0xff] %vm2034_vm9, %v2011_v15  ;;  %v1674_v44 = vsub.f32 1.0, %v1673_v51  ;;  %v2380_v19 = vmul.f32 -1.442695, %v3451_v29  ;;  %v1088_v53 = vadd.f32 %v1087_v16, %v960_v54 }
 0x196   : > { %v2570_v25 = vpop.eup %2569  ;;  %v3459_v50 = vadd.f32 1.0, %v2568_v32 }
 0x197   : > { %v1675_v22 = vmul.f32 %v2566_v31, %v1674_v44  ;;  %v1688_v33 = vmul.f32 %v2570_v25, %v3444_v38  ;;  %2571 = vpow2.f32 %v2380_v19  ;;  %v1304_v12 = vadd.f32 %v1245_v8, %v1088_v53 }
 0x198   : > { %2573 = vrcp.f32 %v3459_v50  ;;  %v1247_v46 = vpop.f32.mrf.mxu2  ;;  %vm1693_vm4 = vweird.f32 %v2570_v25  ;;  %v1713_v8 = vand.u32 2147483648, %v3459_v50  ;;  %v1711_v13 = vand.u32 2147483647, %v3459_v50 }
 0x199   : > { %v1676_v26 = vadd.f32 %v2566_v31, %v1675_v22  ;;  %v1689_v30 = vsub.f32 1.0, %v1688_v33  ;;  %v1340_v3 = vmul.f32 %v3236_v9, %v1304_v12  ;;  %vm1694_vm6 = vmor %vm1692_vm5, %vm1693_vm4  ;;  %vm1707_vm10 = vweird.f32 %v3459_v50 }
 0x19a   : > { %v962_v49 = vpop.f32.mrf.mxu0  ;;  %v1714_v32 = vor.u32 1.1754944e-38, %v1713_v8  ;;  %vm1712_vm12 = vcmp.eq.f32.partialorder %v1711_v13, 8.507059e+37 }
 0x19b   : > { %v1680_v59 = vsel %vm1679_vm2, %v2566_v31, %v1676_v26  ;;  %v1690_v52 = vmul.f32 %v2570_v25, %v1689_v30  ;;  %v1129_v34 = vpop.f32.mrf.mxu3  ;;  %v3472_v62 = vadd.f32 %v3242_v17, %v1340_v3  ;;  %v1115_v30 = vadd.f32 %v3377_v48, %v3254_v23 }
 0x19c   : > { %v1685_v47 = vsel %vm1682_vm3, %v1684_v42, %v1680_v59  ;;  %v3467_v0 = vadd.f32 %v1129_v34, %v3355_v18  ;;  %v1089_v61 = vpop.f32.mrf.mxu1 }
 0x19d   : > { %v2572_v55 = vpop.eup %2571  ;;  %v2012_v57 = vmul.f32 %v1685_v47, %v3415_v35  ;;  %v1691_v58 = vadd.f32 %v2570_v25, %v1690_v52  ;;  %v1090_v24 = vadd.f32 %v1089_v61, %v962_v49  ;;  %v2381_v35 = vmul.f32 -1.442695, %v3472_v62 }
 0x19e   : > { %v2574_v14 = vpop.eup %2573  ;;  %v3474_v1 = vadd.f32 1.0, %v2572_v55 }
 0x19f   : > { %2045 = vst.msk [vmem:[%s3307_s10 + $0x50] sm:$0xff] %vm2034_vm9, %v2012_v57  ;;  %v1695_v18 = vsel %vm1694_vm6, %v2570_v25, %v1691_v58  ;;  %v1703_v2 = vmul.f32 %v2574_v14, %v3459_v50  ;;  %v1305_v60 = vadd.f32 %v1247_v46, %v1090_v24  ;;  %vm1708_vm8 = vweird.f32 %v2574_v14 }
 0x1a0   : > { %v1700_v5 = vsel %vm1697_vm7, %v1699_v63, %v1695_v18  ;;  %2575 = vrcp.f32 %v3474_v1  ;;  %v1250_v51 = vpop.f32.mrf.mxu2  ;;  %vm1709_vm11 = vmor %vm1707_vm10, %vm1708_vm8  ;;  %v1726_v45 = vand.u32 2147483647, %v3474_v1  ;;  %v1728_v46 = vand.u32 2147483648, %v3474_v1 }
 0x1a1   : > { %v2013_v38 = vmul.f32 %v1700_v5, %v3426_v7  ;;  %v1704_v21 = vsub.f32 1.0, %v1703_v2  ;;  %2577 = vpow2.f32 %v2381_v35  ;;  %v1341_v15 = vmul.f32 %v3236_v9, %v1305_v60 }
 0x1a2   : > { %v965_v10 = vpop.f32.mrf.mxu0  ;;  %vm1722_vm14 = vweird.f32 %v3474_v1  ;;  %v1729_v55 = vor.u32 1.1754944e-38, %v1728_v46  ;;  %vm1727_vm0 = vcmp.eq.f32.partialorder %v1726_v45, 8.507059e+37 }
 0x1a3   : > { %2046 = vst.msk [vmem:[%s3307_s10 + $0x58] sm:$0xff] %vm2034_vm9, %v2013_v38  ;;  %v1705_v31 = vmul.f32 %v2574_v14, %v1704_v21  ;;  %v1270_v54 = vpop.f32.mrf.mxu3  ;;  %v3491_v44 = vadd.f32 %v3242_v17, %v1341_v15 }
 0x1a4   : > { %v1314_v7 = vadd.f32 %v1270_v54, %v1113_v6  ;;  %v1092_v20 = vpop.f32.mrf.mxu1 }
 0x1a5   : > { %v1706_v16 = vadd.f32 %v2574_v14, %v1705_v31  ;;  %v1093_v11 = vadd.f32 %v1092_v20, %v965_v10  ;;  %v2382_v50 = vmul.f32 -1.442695, %v3491_v44 }
 0x1a6   : > { %v2576_v39 = vpop.eup %2575  ;;  %v1350_v19 = vmul.f32 %v3236_v9, %v1314_v7 }
 0x1a7   : > { %v2578_v53 = vpop.eup %2577  ;;  %v1710_v25 = vsel %vm1709_vm11, %v2574_v14, %v1706_v16  ;;  %v1718_v27 = vmul.f32 %v2576_v39, %v3474_v1  ;;  %v1306_v41 = vadd.f32 %v1250_v51, %v1093_v11  ;;  %vm1723_vm13 = vweird.f32 %v2576_v39 }
 0x1a8   : > { %v1715_v22 = vsel %vm1712_vm12, %v1714_v32, %v1710_v25  ;;  %v3495_v33 = vadd.f32 1.0, %v2578_v53  ;;  %v3499_v26 = vadd.f32 %v3242_v17, %v1350_v19  ;;  %vm1724_vm15 = vmor %vm1722_vm14, %vm1723_vm13  ;;  %v1252_v57 = vpop.f32.mrf.mxu2 }
 0x1a9   : > { %v2014_v12 = vmul.f32 %v1715_v22, %v3438_v56  ;;  %v1719_v42 = vsub.f32 1.0, %v1718_v27  ;;  %v1342_v4 = vmul.f32 %v3236_v9, %v1306_v41 }
 0x1aa   : > { %2579 = vrcp.f32 %v3495_v33  ;;  %v967_v49 = vpop.f32.mrf.mxu0  ;;  %v2391_v52 = vmul.f32 -1.442695, %v3499_v26  ;;  %v1741_v13 = vand.u32 2147483647, %v3495_v33  ;;  %vm1737_vm2 = vweird.f32 %v3495_v33 }
 0x1ab   : > { %2047 = vst.msk [vmem:[%s3307_s10 + $0x60] sm:$0xff] %vm2034_vm9, %v2014_v12  ;;  %v1720_v59 = vmul.f32 %v2576_v39, %v1719_v42  ;;  %2581 = vpow2.f32 %v2382_v50  ;;  %v3512_v23 = vadd.f32 %v3242_v17, %v1342_v4  ;;  %v1272_v48 = vpop.f32.mrf.mxu3 }
 0x1ac   : > { %v1315_v56 = vadd.f32 %v1272_v48, %v1115_v30  ;;  %v1094_v3 = vpop.f32.mrf.mxu1  ;;  %2583 = vpow2.f32 %v2391_v52  ;;  %vm1742_vm4 = vcmp.eq.f32.partialorder %v1741_v13, 8.507059e+37  ;;  %v3569_v48 = vld [vmem:[%s3873_s3] ss:$0 sm:$0xff] }
 0x1ad   : > { %v1721_v34 = vadd.f32 %v2576_v39, %v1720_v59  ;;  %v2383_v47 = vmul.f32 -1.442695, %v3512_v23  ;;  %v1095_v61 = vadd.f32 %v1094_v3, %v967_v49 }
 0x1ae   : > { %v1351_v58 = vmul.f32 %v3236_v9, %v1315_v56 }
 0x1af   : > { %v1725_v14 = vsel %vm1724_vm15, %v2576_v39, %v1721_v34  ;;  %2585 = vpow2.f32 %v2383_v47  ;;  %v1307_v63 = vadd.f32 %v1252_v57, %v1095_v61 }
 0x1b0   : > { %v2580_v24 = vpop.eup %2579  ;;  %v1730_v1 = vsel %vm1727_vm0, %v1729_v55, %v1725_v14  ;;  %v3519_v18 = vadd.f32 %v3242_v17, %v1351_v58  ;;  %v1255_v53 = vpop.f32.mrf.mxu2 }
 0x1b1   : > { %v2582_v2 = vpop.eup %2581  ;;  %v2015_v35 = vmul.f32 %v1730_v1, %v3451_v29  ;;  %v1733_v5 = vmul.f32 %v2580_v24, %v3495_v33  ;;  %v1343_v38 = vmul.f32 %v3236_v9, %v1307_v63  ;;  %vm1738_vm1 = vweird.f32 %v2580_v24 }
 0x1b2   : > { %v3524_v21 = vadd.f32 1.0, %v2582_v2  ;;  %v2392_v6 = vmul.f32 -1.442695, %v3519_v18  ;;  %v2584_v8 = vpop.eup %2583  ;;  %v1743_v29 = vand.u32 2147483648, %v3495_v33  ;;  %v970_v9 = vpop.f32.mrf.mxu0  ;;  %vm1739_vm3 = vmor %vm1737_vm2, %vm1738_vm1  ;;  %v3553_v33 = vld [vmem:[%s3872_s2] ss:$0 sm:$0xff] }
 0x1b3   : > { %2048 = vst.msk [vmem:[%s3307_s10 + $0x68] sm:$0xff] %vm2034_vm9, %v2015_v35  ;;  %v1734_v60 = vsub.f32 1.0, %v1733_v5  ;;  %v3530_v10 = vadd.f32 %v3242_v17, %v1343_v38  ;;  %v1275_v31 = vpop.f32.mrf.mxu3  ;;  %v3535_v7 = vadd.f32 1.0, %v2584_v8 }
 0x1b4   : > { %2587 = vrcp.f32 %v3524_v21  ;;  %v1097_v54 = vpop.f32.mrf.mxu1  ;;  %v1316_v17 = vadd.f32 %v1275_v31, %v3390_v40  ;;  %v1744_v39 = vor.u32 1.1754944e-38, %v1743_v29  ;;  %v1756_v32 = vand.u32 2147483647, %v3524_v21 }
 0x1b5   : > { %v2586_v15 = vpop.eup %2585  ;;  %v1735_v51 = vmul.f32 %v2580_v24, %v1734_v60  ;;  %2589 = vpow2.f32 %v2392_v6  ;;  %v2384_v20 = vmul.f32 -1.442695, %v3530_v10  ;;  %v1758_v19 = vand.u32 2147483648, %v3524_v21 }
 0x1b6   : > { %v3538_v16 = vadd.f32 1.0, %v2586_v15  ;;  %2591 = vrcp.f32 %v3535_v7  ;;  %vm1752_vm5 = vweird.f32 %v3524_v21  ;;  %v1891_v41 = vand.u32 2147483647, %v3535_v7 }
 0x1b7   : > { %v1736_v11 = vadd.f32 %v2580_v24, %v1735_v51  ;;  %v1893_v22 = vand.u32 2147483648, %v3535_v7  ;;  %v1352_v50 = vmul.f32 %v3553_v33, %v1316_v17  ;;  %vm3560_vm6 = vcmp.eq.f32.partialorder %v1756_v32, 8.507059e+37 }
 0x1b8   : > { %2593 = vrcp.f32 %v3538_v16  ;;  %v1771_v4 = vand.u32 2147483647, %v3538_v16  ;;  %v1773_v45 = vand.u32 2147483648, %v3538_v16  ;;  %v1759_v59 = vor.u32 1.1754944e-38, %v1758_v19 }
 0x1b9   : > { %v1740_v25 = vsel %vm1739_vm3, %v2580_v24, %v1736_v11  ;;  %2595 = vpow2.f32 %v2384_v20  ;;  %vm1887_vm7 = vweird.f32 %v3535_v7  ;;  %vm1767_vm8 = vweird.f32 %v3538_v16 }
 0x1ba   : > { %v2588_v40 = vpop.eup %2587  ;;  %v1745_v27 = vsel %vm1742_vm4, %v1744_v39, %v1740_v25  ;;  %v1098_v47 = vadd.f32 %v1097_v54, %v970_v9  ;;  %vm3579_vm11 = vcmp.eq.f32.partialorder %v1891_v41, 8.507059e+37  ;;  %v1894_v58 = vor.u32 1.1754944e-38, %v1893_v22  ;;  %v972_v14 = vpop.f32.mrf.mxu0 }
 0x1bb   : > { %v2590_v30 = vpop.eup %2589  ;;  %v2016_v12 = vmul.f32 %v1745_v27, %v3472_v62  ;;  %v1748_v42 = vmul.f32 %v2588_v40, %v3524_v21  ;;  %v1277_v46 = vpop.f32.mrf.mxu3  ;;  %v3572_v62 = vadd.f32 %v3569_v48, %v1352_v50  ;;  %vm1753_vm10 = vweird.f32 %v2588_v40 }
 0x1bc   : > { %v3564_v52 = vadd.f32 1.0, %v2590_v30  ;;  %v1099_v56 = vpop.f32.mrf.mxu1  ;;  %v2592_v3 = vpop.eup %2591  ;;  %vm3585_vm12 = vcmp.eq.f32.partialorder %v1771_v4, 8.507059e+37  ;;  %v1774_v35 = vor.u32 1.1754944e-38, %v1773_v45  ;;  %v1317_v5 = vadd.f32 %v1277_v46, %v3411_v28  ;;  %vm1754_vm13 = vmor %vm1752_vm5, %vm1753_vm10 }
 0x1bd   : > { %2049 = vst.msk [vmem:[%s3307_s10 + $0x70] sm:$0xff] %vm2034_vm9, %v2016_v12  ;;  %v1749_v34 = vsub.f32 1.0, %v1748_v42  ;;  %v1883_v55 = vmul.f32 %v2592_v3, %v3535_v7  ;;  %v2393_v60 = vmul.f32 -1.442695, %v3572_v62  ;;  %v1308_v9 = vadd.f32 %v1255_v53, %v1098_v47  ;;  %v1257_v28 = vpop.f32.mrf.mxu2 }
 0x1be   : > { %v2594_v61 = vpop.eup %2593  ;;  %2597 = vrcp.f32 %v3564_v52  ;;  %v1906_v6 = vand.u32 2147483647, %v3564_v52  ;;  %v1908_v29 = vand.u32 2147483648, %v3564_v52  ;;  %vm1888_vm14 = vweird.f32 %v2592_v3 }
 0x1bf   : > { %v2596_v63 = vpop.eup %2595  ;;  %v1750_v24 = vmul.f32 %v2588_v40, %v1749_v34  ;;  %v1763_v1 = vmul.f32 %v2594_v61, %v3538_v16  ;;  %v1884_v38 = vsub.f32 1.0, %v1883_v55  ;;  %v1100_v15 = vadd.f32 %v1099_v56, %v972_v14  ;;  %vm1889_vm1 = vmor %vm1887_vm7, %vm1888_vm14 }
 0x1c0   : > { %v3591_v8 = vadd.f32 1.0, %v2596_v63  ;;  %vm1768_vm15 = vweird.f32 %v2594_v61  ;;  %vm1902_vm0 = vweird.f32 %v3564_v52  ;;  %v1344_v21 = vmul.f32 %v3553_v33, %v1308_v9 }
 0x1c1   : > { %v1751_v31 = vadd.f32 %v2588_v40, %v1750_v24  ;;  %v1764_v13 = vsub.f32 1.0, %v1763_v1  ;;  %v1885_v54 = vmul.f32 %v2592_v3, %v1884_v38  ;;  %vm3608_vm2 = vcmp.eq.f32.partialorder %v1906_v6, 8.507059e+37  ;;  %vm1769_vm3 = vmor %vm1767_vm8, %vm1768_vm15 }
 0x1c2   : > { %2599 = vrcp.f32 %v3591_v8  ;;  %v1909_v27 = vor.u32 1.1754944e-38, %v1908_v29  ;;  %v1786_v22 = vand.u32 2147483647, %v3591_v8  ;;  %v3618_v7 = vadd.f32 %v3569_v48, %v1344_v21  ;;  %v975_v56 = vpop.f32.mrf.mxu0 }
 0x1c3   : > { %v1755_v51 = vsel %vm1754_vm13, %v2588_v40, %v1751_v31  ;;  %v1765_v20 = vmul.f32 %v2594_v61, %v1764_v13  ;;  %v1280_v17 = vpop.f32.mrf.mxu3  ;;  %v1886_v32 = vadd.f32 %v2592_v3, %v1885_v54  ;;  %2601 = vpow2.f32 %v2393_v60 }
 0x1c4   : > { %v2598_v11 = vpop.eup %2597  ;;  %v1760_v39 = vsel %vm3560_vm6, %v1759_v59, %v1755_v51  ;;  %v1102_v50 = vpop.f32.mrf.mxu1  ;;  %v1353_v4 = vmul.f32 %v3553_v33, %v1317_v5  ;;  %v2385_v49 = vmul.f32 -1.442695, %v3618_v7  ;;  %v1309_v59 = vadd.f32 %v1257_v28, %v1100_v15 }
 0x1c5   : > { %v2017_v19 = vmul.f32 %v1760_v39, %v3491_v44  ;;  %v1766_v53 = vadd.f32 %v2594_v61, %v1765_v20  ;;  %v1898_v25 = vmul.f32 %v2598_v11, %v3564_v52  ;;  %v1890_v41 = vsel %vm1889_vm1, %v2592_v3, %v1886_v32 }
 0x1c6   : > { %v1788_v44 = vand.u32 2147483648, %v3591_v8  ;;  %v1895_v30 = vsel %vm3579_vm11, %v1894_v58, %v1890_v41  ;;  %vm1903_vm4 = vweird.f32 %v2598_v11  ;;  %2603 = vpow2.f32 %v2385_v49 }
 0x1c7   : > { %2050 = vst.msk [vmem:[%s3307_s10 + $0x78] sm:$0xff] %vm2034_vm9, %v2017_v19  ;;  %v1770_v12 = vsel %vm1769_vm3, %v2594_v61, %v1766_v53  ;;  %v1899_v42 = vsub.f32 1.0, %v1898_v25  ;;  %v2026_v45 = vmul.f32 %v1895_v30, %v3499_v26  ;;  %v3634_v55 = vadd.f32 %v3569_v48, %v1353_v4  ;;  %vm1904_vm5 = vmor %vm1902_vm0, %vm1903_vm4 }
 0x1c8   : > { %v2600_v16 = vpop.eup %2599  ;;  %v1775_v46 = vsel %vm3585_vm12, %v1774_v35, %v1770_v12  ;;  %v1345_v26 = vmul.f32 %v3553_v33, %v1309_v59  ;;  %v1318_v57 = vadd.f32 %v1280_v17, %v3429_v36  ;;  %v1103_v63 = vadd.f32 %v1102_v50, %v975_v56  ;;  %v1260_v35 = vpop.f32.mrf.mxu2 }
 0x1c9   : > { %v2018_v3 = vmul.f32 %v1775_v46, %v3512_v23  ;;  %v1900_v34 = vmul.f32 %v2598_v11, %v1899_v42  ;;  %v1778_v47 = vmul.f32 %v2600_v16, %v3591_v8  ;;  %v2602_v61 = vpop.eup %2601  ;;  %2059 = vst.msk [vmem:[%s3307_s10 + $0xc0] sm:$0xff] %vm2034_vm9, %v2026_v45  ;;  %v2394_v1 = vmul.f32 -1.442695, %v3634_v55 }
 0x1ca   : > { %v3640_v23 = vadd.f32 1.0, %v2602_v61  ;;  %v3646_v2 = vadd.f32 %v3569_v48, %v1345_v26  ;;  %v1354_v5 = vmul.f32 %v3553_v33, %v1318_v57  ;;  %vm1783_vm6 = vweird.f32 %v2600_v16 }
 0x1cb   : > { %2051 = vst.msk [vmem:[%s3307_s10 + $0x80] sm:$0xff] %vm2034_vm9, %v2018_v3  ;;  %v1901_v58 = vadd.f32 %v2598_v11, %v1900_v34  ;;  %v1779_v14 = vsub.f32 1.0, %v1778_v47  ;;  %v1282_v24 = vpop.f32.mrf.mxu3  ;;  %vm1782_vm7 = vweird.f32 %v3591_v8  ;;  %vm1787_vm10 = vcmp.eq.f32.partialorder %v1786_v22, 8.507059e+37 }
 0x1cc   : > { %v1319_v36 = vadd.f32 %v1282_v24, %v3442_v43  ;;  %2605 = vrcp.f32 %v3640_v23  ;;  %v2386_v13 = vmul.f32 -1.442695, %v3646_v2  ;;  %v3657_v29 = vadd.f32 %v3569_v48, %v1354_v5  ;;  %v2604_v43 = vpop.eup %2603  ;;  %vm1784_vm8 = vmor %vm1782_vm7, %vm1783_vm6  ;;  %v1104_v15 = vpop.f32.mrf.mxu1 }
 0x1cd   : > { %v1905_v38 = vsel %vm1904_vm5, %v2598_v11, %v1901_v58  ;;  %v1780_v6 = vmul.f32 %v2600_v16, %v1779_v14  ;;  %2607 = vpow2.f32 %v2394_v1  ;;  %v1789_v9 = vor.u32 1.1754944e-38, %v1788_v44  ;;  %v977_v11 = vpop.f32.mrf.mxu0 }
 0x1ce   : > { %v1910_v52 = vsel %vm3608_vm2, %v1909_v27, %v1905_v38  ;;  %v1310_v54 = vadd.f32 %v1260_v35, %v1103_v63  ;;  %v1355_v28 = vmul.f32 %v3553_v33, %v1319_v36  ;;  %v3662_v51 = vadd.f32 1.0, %v2604_v43 }
 0x1cf   : > { %v2027_v60 = vmul.f32 %v1910_v52, %v3519_v18  ;;  %v1781_v31 = vadd.f32 %v2600_v16, %v1780_v6  ;;  %2609 = vpow2.f32 %v2386_v13  ;;  %v2395_v18 = vmul.f32 -1.442695, %v3657_v29 }
 0x1d0   : > { %v1346_v17 = vmul.f32 %v3553_v33, %v1310_v54  ;;  %v3667_v39 = vadd.f32 %v3569_v48, %v1355_v28  ;;  %2611 = vrcp.f32 %v3662_v51  ;;  %v1105_v19 = vadd.f32 %v1104_v15, %v977_v11  ;;  %v1262_v12 = vpop.f32.mrf.mxu2 }
 0x1d1   : > { %2060 = vst.msk [vmem:[%s3307_s10 + $0xc8] sm:$0xff] %vm2034_vm9, %v2027_v60  ;;  %v1785_v8 = vsel %vm1784_vm8, %v2600_v16, %v1781_v31  ;;  %v1921_v40 = vand.u32 2147483647, %v3640_v23  ;;  %2613 = vpow2.f32 %v2395_v18  ;;  %v1923_v27 = vand.u32 2147483648, %v3640_v23 }
 0x1d2   : > { %v1790_v20 = vsel %vm1787_vm10, %v1789_v9, %v1785_v8  ;;  %v2606_v32 = vpop.eup %2605  ;;  %v3679_v22 = vadd.f32 %v3569_v48, %v1346_v17  ;;  %v1801_v50 = vand.u32 2147483647, %v3662_v51  ;;  %v1803_v30 = vand.u32 2147483648, %v3662_v51 }
 0x1d3   : > { %v2019_v21 = vmul.f32 %v1790_v20, %v3530_v10  ;;  %v2608_v53 = vpop.eup %2607  ;;  %v1913_v25 = vmul.f32 %v2606_v32, %v3640_v23  ;;  %v2396_v10 = vmul.f32 -1.442695, %v3667_v39  ;;  %vm1918_vm11 = vweird.f32 %v2606_v32  ;;  %v1285_v49 = vpop.f32.mrf.mxu3 }
 0x1d4   : > { %v3676_v41 = vadd.f32 1.0, %v2608_v53  ;;  %v1311_v4 = vadd.f32 %v1262_v12, %v1105_v19  ;;  %v2387_v46 = vmul.f32 -1.442695, %v3679_v22  ;;  %vm1917_vm12 = vweird.f32 %v3640_v23  ;;  %v3715_v13 = vpop.f32.mrf.mxu1 }
 0x1d5   : > { %2052 = vst.msk [vmem:[%s3307_s10 + $0x88] sm:$0xff] %vm2034_vm9, %v2019_v21  ;;  %v1914_v44 = vsub.f32 1.0, %v1913_v25  ;;  %v2610_v42 = vpop.eup %2609  ;;  %vm3689_vm13 = vcmp.eq.f32.partialorder %v1921_v40, 8.507059e+37  ;;  %v1924_v3 = vor.u32 1.1754944e-38, %v1923_v27  ;;  %vm1797_vm14 = vweird.f32 %v3662_v51  ;;  %vm1919_vm0 = vmor %vm1917_vm12, %vm1918_vm11  ;;  %v980_v20 = vpop.f32.mrf.mxu0 }
 0x1d6   : > { %2615 = vrcp.f32 %v3676_v41  ;;  %v3685_v45 = vadd.f32 1.0, %v2610_v42  ;;  %v2612_v59 = vpop.eup %2611  ;;  %vm3695_vm15 = vcmp.eq.f32.partialorder %v1801_v50, 8.507059e+37  ;;  %v1804_v57 = vor.u32 1.1754944e-38, %v1803_v30 }
 0x1d7   : > { %v1915_v16 = vmul.f32 %v2606_v32, %v1914_v44  ;;  %2617 = vpow2.f32 %v2396_v10  ;;  %v2614_v34 = vpop.eup %2613  ;;  %v1793_v61 = vmul.f32 %v2612_v59, %v3662_v51  ;;  %v1936_v58 = vand.u32 2147483647, %v3676_v41 }
 0x1d8   : > { %2619 = vrcp.f32 %v3685_v45  ;;  %v1938_v14 = vand.u32 2147483648, %v3676_v41  ;;  %v3703_v23 = vadd.f32 1.0, %v2614_v34  ;;  %v1320_v63 = vadd.f32 %v1285_v49, %v3454_v37  ;;  %v1265_v50 = vpop.f32.mrf.mxu2 }
 0x1d9   : > { %v1916_v47 = vadd.f32 %v2606_v32, %v1915_v16  ;;  %v1794_v1 = vsub.f32 1.0, %v1793_v61  ;;  %vm1932_vm1 = vweird.f32 %v3676_v41  ;;  %2621 = vpow2.f32 %v2387_v46 }
 0x1da   : > { %v1347_v35 = vmul.f32 %v3553_v33, %v1311_v4  ;;  %v1816_v38 = vand.u32 2147483647, %v3685_v45  ;;  %v1818_v6 = vand.u32 2147483648, %v3685_v45  ;;  %2623 = vrcp.f32 %v3703_v23 }
 0x1db   : > { %v1920_v24 = vsel %vm1919_vm0, %v2606_v32, %v1916_v47  ;;  %v1795_v60 = vmul.f32 %v2612_v59, %v1794_v1  ;;  %vm1798_vm2 = vweird.f32 %v2612_v59  ;;  %vm3717_vm3 = vcmp.eq.f32.partialorder %v1936_v58, 8.507059e+37 }
 0x1dc   : > { %v2616_v5 = vpop.eup %2615  ;;  %v1925_v36 = vsel %vm3689_vm13, %v1924_v3, %v1920_v24  ;;  %v1939_v9 = vor.u32 1.1754944e-38, %v1938_v14  ;;  %v1356_v28 = vmul.f32 %v3553_v33, %v1320_v63  ;;  %vm1812_vm4 = vweird.f32 %v3685_v45  ;;  %vm1799_vm5 = vmor %vm1797_vm14, %vm1798_vm2  ;;  %v1109_v58 = vpop.f32.mrf.mxu1 }
 0x1dd   : > { %v2618_v52 = vpop.eup %2617  ;;  %v2028_v37 = vmul.f32 %v1925_v36, %v3572_v62  ;;  %v1928_v31 = vmul.f32 %v2616_v5, %v3676_v41  ;;  %v1796_v8 = vadd.f32 %v2612_v59, %v1795_v60  ;;  %v3728_v18 = vadd.f32 %v3569_v48, %v1347_v35  ;;  %v982_v36 = vpop.f32.mrf.mxu0 }
 0x1de   : > { %v3721_v54 = vadd.f32 1.0, %v2618_v52  ;;  %v2620_v15 = vpop.eup %2619  ;;  %vm1933_vm6 = vweird.f32 %v2616_v5  ;;  %vm3733_vm7 = vcmp.eq.f32.partialorder %v1816_v38, 8.507059e+37  ;;  %v1819_v32 = vor.u32 1.1754944e-38, %v1818_v6 }
 0x1df   : > { %2061 = vst.msk [vmem:[%s3307_s10 + $0xd0] sm:$0xff] %vm2034_vm9, %v2028_v37  ;;  %v1929_v62 = vsub.f32 1.0, %v1928_v31  ;;  %v1808_v17 = vmul.f32 %v2620_v15, %v3685_v45  ;;  %v1951_v21 = vand.u32 2147483647, %v3703_v23  ;;  %v2622_v19 = vpop.eup %2621  ;;  %v1800_v53 = vsel %vm1799_vm5, %v2612_v59, %v1796_v8  ;;  %vm1934_vm10 = vmor %vm1932_vm1, %vm1933_vm6 }
 0x1e0   : > { %v1953_v40 = vand.u32 2147483648, %v3703_v23  ;;  %2625 = vrcp.f32 %v3721_v54  ;;  %v2624_v51 = vpop.eup %2623  ;;  %v1805_v27 = vsel %vm3695_vm15, %v1804_v57, %v1800_v53  ;;  %vm1947_vm8 = vweird.f32 %v3703_v23  ;;  %v1287_v57 = vpop.f32.mrf.mxu3 }
 0x1e1   : > { %v1930_v25 = vmul.f32 %v2616_v5, %v1929_v62  ;;  %v1809_v10 = vsub.f32 1.0, %v1808_v17  ;;  %v3743_v44 = vadd.f32 1.0, %v2622_v19  ;;  %v2020_v30 = vmul.f32 %v1805_v27, %v3618_v7 }
 0x1e2   : > { %v1943_v42 = vmul.f32 %v2624_v51, %v3703_v23  ;;  %v2388_v4 = vmul.f32 -1.442695, %v3728_v18  ;;  %vm1813_vm11 = vweird.f32 %v2620_v15  ;;  %v3753_v46 = vadd.f32 %v3569_v48, %v1356_v28  ;;  %v1267_v28 = vpop.f32.mrf.mxu2 }
 0x1e3   : > { %v1931_v12 = vadd.f32 %v2616_v5, %v1930_v25  ;;  %v1810_v16 = vmul.f32 %v2620_v15, %v1809_v10  ;;  %2627 = vrcp.f32 %v3743_v44  ;;  %2053 = vst.msk [vmem:[%s3307_s10 + $0x90] sm:$0xff] %vm2034_vm9, %v2020_v30  ;;  %vm3757_vm12 = vcmp.eq.f32.partialorder %v1951_v21, 8.507059e+37  ;;  %vm1814_vm14 = vmor %vm1812_vm4, %vm1813_vm11 }
 0x1e4   : > { %v1944_v7 = vsub.f32 1.0, %v1943_v42  ;;  %v1954_v56 = vor.u32 1.1754944e-38, %v1953_v40  ;;  %vm1962_vm13 = vweird.f32 %v3721_v54  ;;  %v1966_v34 = vand.u32 2147483647, %v3721_v54 }
 0x1e5   : > { %v1935_v49 = vsel %vm1934_vm10, %v2616_v5, %v1931_v12  ;;  %v1811_v3 = vadd.f32 %v2620_v15, %v1810_v16  ;;  %vm1948_vm15 = vweird.f32 %v2624_v51  ;;  %2629 = vpow2.f32 %v2388_v4 }
 0x1e6   : > { %v1940_v41 = vsel %vm3717_vm3, %v1939_v9, %v1935_v49  ;;  %v2626_v47 = vpop.eup %2625  ;;  %v1945_v26 = vmul.f32 %v2624_v51, %v1944_v7  ;;  %v1831_v63 = vand.u32 2147483647, %v3743_v44  ;;  %v1968_v1 = vand.u32 2147483648, %v3721_v54  ;;  %vm1949_vm0 = vmor %vm1947_vm8, %vm1948_vm15 }
 0x1e7   : > { %v2029_v61 = vmul.f32 %v1940_v41, %v3634_v55  ;;  %v1815_v14 = vsel %vm1814_vm14, %v2620_v15, %v1811_v3  ;;  %v1958_v24 = vmul.f32 %v2626_v47, %v3721_v54  ;;  %v2397_v35 = vmul.f32 -1.442695, %v3753_v46 }
 0x1e8   : > { %v1820_v55 = vsel %vm3733_vm7, %v1819_v32, %v1815_v14  ;;  %v1946_v45 = vadd.f32 %v2624_v51, %v1945_v26  ;;  %v1108_v5 = vadd.f32 %v3715_v13, %v980_v20  ;;  %v1321_v37 = vadd.f32 %v1287_v57, %v3467_v0 }
 0x1e9   : > { %2062 = vst.msk [vmem:[%s3307_s10 + $0xd8] sm:$0xff] %vm2034_vm9, %v2029_v61  ;;  %v2628_v38 = vpop.eup %2627  ;;  %v2021_v6 = vmul.f32 %v1820_v55, %v3646_v2  ;;  %v1959_v52 = vsub.f32 1.0, %v1958_v24  ;;  %v1110_v60 = vadd.f32 %v1109_v58, %v982_v36  ;;  %vm1963_vm1 = vweird.f32 %v2626_v47 }
 0x1ea   : > { %v1950_v31 = vsel %vm1949_vm0, %v2624_v51, %v1946_v45  ;;  %v1823_v43 = vmul.f32 %v2628_v38, %v3743_v44  ;;  %2631 = vpow2.f32 %v2397_v35  ;;  %v1312_v9 = vadd.f32 %v1265_v50, %v1108_v5  ;;  %vm1964_vm3 = vmor %vm1962_vm13, %vm1963_vm1 }
 0x1eb   : > { %2054 = vst.msk [vmem:[%s3307_s10 + $0x98] sm:$0xff] %vm2034_vm9, %v2021_v6  ;;  %v1955_v13 = vsel %vm3757_vm12, %v1954_v56, %v1950_v31  ;;  %v1960_v2 = vmul.f32 %v2626_v47, %v1959_v52  ;;  %v1357_v23 = vmul.f32 %v3553_v33, %v1321_v37  ;;  %v2630_v15 = vpop.eup %2629  ;;  %v1833_v62 = vand.u32 2147483648, %v3743_v44 }
 0x1ec   : > { %v2030_v0 = vmul.f32 %v1955_v13, %v3657_v29  ;;  %v1824_v8 = vsub.f32 1.0, %v1823_v43  ;;  %v1313_v20 = vadd.f32 %v1267_v28, %v1110_v60  ;;  %v1511_v11 = vadd.f32 1.0, %v2630_v15 }
 0x1ed   : > { %v1961_v17 = vadd.f32 %v2626_v47, %v1960_v2  ;;  %v1348_v32 = vmul.f32 %v3553_v33, %v1312_v9  ;;  %v3792_v21 = vadd.f32 %v3569_v48, %v1357_v23  ;;  %vm1828_vm2 = vweird.f32 %v2628_v38 }
 0x1ee   : > { %2063 = vst.msk [vmem:[%s3307_s10 + $0xe0] sm:$0xff] %vm2034_vm9, %v2030_v0  ;;  %v1825_v19 = vmul.f32 %v2628_v38, %v1824_v8  ;;  %v1969_v29 = vor.u32 1.1754944e-38, %v1968_v1  ;;  %v1349_v53 = vmul.f32 %v3553_v33, %v1313_v20  ;;  %vm1967_vm4 = vcmp.eq.f32.partialorder %v1966_v34, 8.507059e+37 }
 0x1ef   : > { %v1965_v25 = vsel %vm1964_vm3, %v2626_v47, %v1961_v17  ;;  %2633 = vrcp.f32 %v1511_v11  ;;  %vm1827_vm5 = vweird.f32 %v3743_v44  ;;  %v3802_v10 = vadd.f32 %v3569_v48, %v1348_v32 }
 0x1f0   : > { %v2632_v40 = vpop.eup %2631  ;;  %v1826_v51 = vadd.f32 %v2628_v38, %v1825_v19  ;;  %v1970_v27 = vsel %vm1967_vm4, %v1969_v29, %v1965_v25  ;;  %vm1829_vm6 = vmor %vm1827_vm5, %vm1828_vm2  ;;  %v1834_v50 = vor.u32 1.1754944e-38, %v1833_v62  ;;  %v2398_v33 = vmul.f32 -1.442695, %v3792_v21 }
 0x1f1   : > { %v2031_v54 = vmul.f32 %v1970_v27, %v3667_v39  ;;  %v1520_v30 = vadd.f32 1.0, %v2632_v40  ;;  %vm1832_vm7 = vcmp.eq.f32.partialorder %v1831_v63, 8.507059e+37  ;;  %v2389_v42 = vmul.f32 -1.442695, %v3802_v10 }
 0x1f2   : > { %v1830_v12 = vsel %vm1829_vm6, %v2628_v38, %v1826_v51  ;;  %v3808_v4 = vadd.f32 %v3569_v48, %v1349_v53  ;;  %v1846_v56 = vand.u32 2147483647, %v1511_v11  ;;  %v1848_v48 = vand.u32 2147483648, %v1511_v11 }
 0x1f3   : > { %v1835_v44 = vsel %vm1832_vm7, %v1834_v50, %v1830_v12  ;;  %2064 = vst.msk [vmem:[%s3307_s10 + $0xe8] sm:$0xff] %vm2034_vm9, %v2031_v54  ;;  %2635 = vrcp.f32 %v1520_v30  ;;  %vm1842_vm10 = vweird.f32 %v1511_v11  ;;  %v1981_v24 = vand.u32 2147483647, %v1520_v30 }
 0x1f4   : > { %v2022_v16 = vmul.f32 %v1835_v44, %v3679_v22  ;;  %2637 = vpow2.f32 %v2389_v42  ;;  %v2390_v49 = vmul.f32 -1.442695, %v3808_v4  ;;  %vm1847_vm11 = vcmp.eq.f32.partialorder %v1846_v56, 8.507059e+37 }
 0x1f5   : > { %v2634_v39 = vpop.eup %2633  ;;  %2639 = vpow2.f32 %v2398_v33  ;;  %v1849_v63 = vor.u32 1.1754944e-38, %v1848_v48  ;;  %v1983_v1 = vand.u32 2147483648, %v1520_v30  ;;  %vm1977_vm14 = vweird.f32 %v1520_v30 }
 0x1f6   : > { %2055 = vst.msk [vmem:[%s3307_s10 + $0xa0] sm:$0xff] %vm2034_vm9, %v2022_v16  ;;  %v1838_v7 = vmul.f32 %v2634_v39, %v1511_v11  ;;  %2641 = vpow2.f32 %v2390_v49  ;;  %vm1843_vm8 = vweird.f32 %v2634_v39  ;;  %vm1982_vm0 = vcmp.eq.f32.partialorder %v1981_v24, 8.507059e+37 }
 0x1f7   : > { %vm1844_vm12 = vmor %vm1842_vm10, %vm1843_vm8  ;;  %v1984_v6 = vor.u32 1.1754944e-38, %v1983_v1 }
 0x1f8   : > { %v1839_v59 = vsub.f32 1.0, %v1838_v7 }
 0x1f9   : > { %v2636_v41 = vpop.eup %2635 }
 0x1fa   : > { %v2638_v3 = vpop.eup %2637  ;;  %v1840_v34 = vmul.f32 %v2634_v39, %v1839_v59  ;;  %v1973_v47 = vmul.f32 %v2636_v41, %v1520_v30  ;;  %vm1978_vm13 = vweird.f32 %v2636_v41 }
 0x1fb   : > { %v2640_v61 = vpop.eup %2639  ;;  %v1512_v22 = vadd.f32 1.0, %v2638_v3  ;;  %vm1979_vm15 = vmor %vm1977_vm14, %vm1978_vm13 }
 0x1fc   : > { %v1841_v26 = vadd.f32 %v2634_v39, %v1840_v34  ;;  %v1974_v57 = vsub.f32 1.0, %v1973_v47  ;;  %v1521_v58 = vadd.f32 1.0, %v2640_v61  ;;  %v2642_v14 = vpop.eup %2641 }
 0x1fd   : > { %2643 = vrcp.f32 %v1512_v22  ;;  %v1513_v38 = vadd.f32 1.0, %v2642_v14  ;;  %v1861_v9 = vand.u32 2147483647, %v1512_v22  ;;  %v1863_v28 = vand.u32 2147483648, %v1512_v22 }
 0x1fe   : > { %v1845_v55 = vsel %vm1844_vm12, %v2634_v39, %v1841_v26  ;;  %v1975_v45 = vmul.f32 %v2636_v41, %v1974_v57  ;;  %2645 = vrcp.f32 %v1521_v58  ;;  %v1996_v15 = vand.u32 2147483647, %v1521_v58 }
 0x1ff   : > { %v1850_v35 = vsel %vm1847_vm11, %v1849_v63, %v1845_v55  ;;  %2647 = vrcp.f32 %v1513_v38  ;;  %v1998_v62 = vand.u32 2147483648, %v1521_v58  ;;  %vm1857_vm3 = vweird.f32 %v1512_v22 }
 0x200   : > { %v2023_v5 = vmul.f32 %v1850_v35, %v3728_v18  ;;  %v1976_v36 = vadd.f32 %v2636_v41, %v1975_v45  ;;  %vm1862_vm4 = vcmp.eq.f32.partialorder %v1861_v9, 8.507059e+37  ;;  %vm1992_vm5 = vweird.f32 %v1521_v58 }
 0x201   : > { %vm1997_vm7 = vcmp.eq.f32.partialorder %v1996_v15, 8.507059e+37  ;;  %v1999_v53 = vor.u32 1.1754944e-38, %v1998_v62  ;;  %v1876_v25 = vand.u32 2147483647, %v1513_v38  ;;  %v1878_v40 = vand.u32 2147483648, %v1513_v38 }
 0x202   : > { %2056 = vst.msk [vmem:[%s3307_s10 + $0xa8] sm:$0xff] %vm2034_vm9, %v2023_v5  ;;  %v1980_v52 = vsel %vm1979_vm15, %v2636_v41, %v1976_v36  ;;  %vm1872_vm11 = vweird.f32 %v1513_v38 }
 0x203   : > { %v2644_v37 = vpop.eup %2643  ;;  %v1985_v60 = vsel %vm1982_vm0, %v1984_v6, %v1980_v52  ;;  %v1879_v42 = vor.u32 1.1754944e-38, %v1878_v40  ;;  %vm1877_vm13 = vcmp.eq.f32.partialorder %v1876_v25, 8.507059e+37 }
 0x204   : > { %v2646_v31 = vpop.eup %2645  ;;  %v2032_v43 = vmul.f32 %v1985_v60, %v3753_v46  ;;  %v1853_v13 = vmul.f32 %v2644_v37, %v1512_v22  ;;  %vm1858_vm1 = vweird.f32 %v2644_v37  ;;  %v1864_v46 = vor.u32 1.1754944e-38, %v1863_v28 }
 0x205   : > { %v1988_v2 = vmul.f32 %v2646_v31, %v1521_v58  ;;  %v2648_v0 = vpop.eup %2647  ;;  %vm1993_vm2 = vweird.f32 %v2646_v31  ;;  %vm1859_vm6 = vmor %vm1857_vm3, %vm1858_vm1 }
 0x206   : > { %2065 = vst.msk [vmem:[%s3307_s10 + $0xf0] sm:$0xff] %vm2034_vm9, %v2032_v43  ;;  %v1854_v18 = vsub.f32 1.0, %v1853_v13  ;;  %v1868_v17 = vmul.f32 %v2648_v0, %v1513_v38  ;;  %vm1994_vm8 = vmor %vm1992_vm5, %vm1993_vm2  ;;  %vm1873_vm10 = vweird.f32 %v2648_v0 }
 0x207   : > { %v1989_v23 = vsub.f32 1.0, %v1988_v2  ;;  %vm1874_vm12 = vmor %vm1872_vm11, %vm1873_vm10 }
 0x208   : > { %v1855_v8 = vmul.f32 %v2644_v37, %v1854_v18  ;;  %v1869_v19 = vsub.f32 1.0, %v1868_v17 }
 0x209   : > { %v1990_v20 = vmul.f32 %v2646_v31, %v1989_v23 }
 0x20a   : > { %v1856_v11 = vadd.f32 %v2644_v37, %v1855_v8  ;;  %v1870_v50 = vmul.f32 %v2648_v0, %v1869_v19 }
 0x20b   : > { %v1991_v32 = vadd.f32 %v2646_v31, %v1990_v20 }
 0x20c   : > { %v1860_v29 = vsel %vm1859_vm6, %v2644_v37, %v1856_v11  ;;  %v1871_v12 = vadd.f32 %v2648_v0, %v1870_v50 }
 0x20d   : > { %v1865_v51 = vsel %vm1862_vm4, %v1864_v46, %v1860_v29  ;;  %v1995_v27 = vsel %vm1994_vm8, %v2646_v31, %v1991_v32 }
 0x20e   : > { %v2024_v54 = vmul.f32 %v1865_v51, %v3802_v10  ;;  %v2000_v30 = vsel %vm1997_vm7, %v1999_v53, %v1995_v27  ;;  %v1875_v44 = vsel %vm1874_vm12, %v2648_v0, %v1871_v12 }
 0x20f   : > { %v2033_v33 = vmul.f32 %v2000_v30, %v3792_v21  ;;  %v1880_v16 = vsel %vm1877_vm13, %v1879_v42, %v1875_v44 }
 0x210   : > { %2057 = vst.msk [vmem:[%s3307_s10 + $0xb0] sm:$0xff] %vm2034_vm9, %v2024_v54  ;;  %v2025_v10 = vmul.f32 %v1880_v16, %v3808_v4 }
 0x211   : > { %2066 = vst.msk [vmem:[%s3307_s10 + $0xf8] sm:$0xff] %vm2034_vm9, %v2033_v33 }
 0x212   : > { %2058 = vst.msk [vmem:[%s3307_s10 + $0xb8] sm:$0xff] %vm2034_vm9, %v2025_v10 }
 0x213   : > { %2678 = shalt.err (!%p2675_p5)
}
 0x214   : > { %s2733_s5 = smov 128   ;;  %s2734_s10 = smov 8  }
 0x215   : > { %2460 = dma.vmem_to_hbm [thread:$0]  (%p2800_p4), %s2084_s26, 4096, %s2086_s29, %s2068_s7, %s2733_s5, %s2733_s5, %s2734_s10  }
 0x216 PF: > { %p2466_p6 = scmp.ge.s32.totalorder %s2729_s20, 2  ;;  %s2100_s14 = sand.u32 1, %s2709_s15  }
 0x217   : > { %s2101_s21 = scalar_lea.sflag [#allocation3], %s2100_s14 }
 0x218   : > { %p2463_p7 = pnand %p2466_p6, %p2807_p8 }
 0x21a   : > { %p2464_p9 = pneg %p2463_p7 }
 0x21c   : > { %2704 = dma.done.wait (%p2464_p9), %s2101_s21, 4096  }
 0x21d   : > { %2706 = vsyncadd (%p2464_p9), %s2101_s21, 4294963200  ;;  %s17_s20 = sadd.s32 1, %s2729_s20   ;;  %s3895_s15 = smov %s2713_s16 }
 0x21e   : > { %p14_p10 = scmp.ge.s32.totalorder %s17_s20, 4   ;;  %s3896_s16 = smov %s2717_s17 }
 0x21f   : > { %s3897_s17 = smov %s2813_s28  ;;  %s3898_s18 = smov %s2725_s19 }
 0x220   : > { %s3899_s19 = smov %s3901_s23  ;;  %16 = sbr.rel (!%p14_p10) target bundleno = 4 (0x4), region = 71 }
 0x225   :  { %2107 = vsyncpa [#allocation3], 1 }
 0x226   :  { %2109 = vsyncpa [#allocation3 + $0x1], 1 }

</bundles_post_ra>
